<compile_context>
chip_gen: v7x
topology: tpu7x:2x2x1
jax: 0.10.0
libtpu: 0.0.40
codegen_flags: <defaults>
</compile_context>

<pallas_src>
import jax
import jax.numpy as jnp
from jax.experimental import pallas as pl
from jax.experimental.pallas import tpu as pltpu


# --------------------------- Pallas kernel ----------------------------------

def _downsample_kernel(w_ref, x_ref, o_ref):
    # w_ref: (9, Cout, C)  bf16    tap index t = 3*di + dj
    # x_ref: (1, 4, C, Lq) bf16    parity plane k = 2*p + q, flattened (Hq, Wp2)
    # o_ref: (1, Cout, 4, H2, W2)  dim 2 is output parity k = 2*i + j
    _, cout, _ = w_ref.shape
    _, _, _, h2, w2 = o_ref.shape
    wp2 = w2 + 1                       # parity-plane row stride (incl. one pad column)
    nspan = h2 * wp2                   # flat span covering every output of one parity

    for i in range(2):                 # output row parity
        for j in range(2):             # output col parity
            acc = jnp.zeros((cout, nspan), jnp.float32)
            for di in range(3):
                for dj in range(3):
                    r, s = i + di, j + dj
                    p, rb = r % 2, r // 2
                    q, sb = s % 2, s // 2
                    off = rb * wp2 + sb                            # static offset
                    tap = x_ref[0, 2 * p + q, :, off:off + nspan]  # (C, nspan) bf16
                    acc = acc + jnp.dot(w_ref[3 * di + dj], tap,
                                        preferred_element_type=jnp.float32)
            out_k = acc.astype(o_ref.dtype)
            k = 2 * i + j
            # Compact store: drop the one garbage (pad) column per row.
            for h in range(h2):
                o_ref[0, :, k, h, :] = out_k[:, h * wp2: h * wp2 + w2]


# --------------------------- forward wrapper --------------------------------

def downsample_forward(x, weight):
    """x: (B, C, H, W) f32 NCHW; weight: (C//2, C, 3, 3) torch Conv2d layout.

    Returns (B, 2*C, H//2, W//2) == Conv2d(3x3, pad=1, no bias) + PixelUnshuffle(2).
    """
    B, C, H, W = x.shape
    Cout = weight.shape[0]
    assert weight.shape == (C // 2, C, 3, 3)
    assert H % 2 == 0 and W % 2 == 0
    H2, W2 = H // 2, W // 2
    Wp2 = W2 + 1                # parity-plane width (left/right pad included)
    Hq = H2 + 2                 # parity-plane rows (+1 halo row, +1 slack row)
    Lq = Hq * Wp2

    # Zero pad: 1 row top, 3 rows bottom (1 halo + 2 slack), 1 col left/right.
    xpad = jnp.pad(x, ((0, 0), (0, 0), (1, 3), (1, 1)))
    # Parity split + flatten: xps[b, 2p+q, c, hh*Wp2 + ww] = xpad[b, c, 2hh+p, 2ww+q].
    xps = xpad.reshape(B, C, Hq, 2, Wp2, 2).transpose(0, 3, 5, 1, 2, 4)
    xps = xps.reshape(B, 4, C, Lq).astype(jnp.bfloat16)

    # Weight taps: (Cout, C, 3, 3) -> (9, Cout, C), tap index t = 3*di + dj.
    w_taps = jnp.transpose(weight, (2, 3, 0, 1)).reshape(9, Cout, C).astype(jnp.bfloat16)

    out5 = pl.pallas_call(
        _downsample_kernel,
        out_shape=jax.ShapeDtypeStruct((B, Cout, 4, H2, W2), x.dtype),
        grid=(B,),
        in_specs=[
            pl.BlockSpec((9, Cout, C), lambda b: (0, 0, 0)),     # weights, resident
            pl.BlockSpec((1, 4, C, Lq), lambda b: (b, 0, 0, 0)), # parity-split image
        ],
        out_specs=pl.BlockSpec((1, Cout, 4, H2, W2), lambda b: (b, 0, 0, 0, 0)),
        compiler_params=pltpu.CompilerParams(
            dimension_semantics=("parallel",),
            vmem_limit_bytes=64 * 1024 * 1024),
    )(w_taps, xps)

    # PixelUnshuffle channel order co*4 + 2i + j == merging dims (Cout, 4): free reshape.
    return out5.reshape(B, 4 * Cout, H2, W2)


# --------------------------- pure-JAX reference ------------------------------

def ref_forward(x, weight):
    """Reference with bf16-truncated operands (matches the kernel's MXU input precision)."""
    B, C, H, W = x.shape
    Cout = weight.shape[0]
    xt = x.astype(jnp.bfloat16).astype(jnp.float32)
    wt = weight.astype(jnp.bfloat16).astype(jnp.float32)
    conv = jax.lax.conv_general_dilated(
        xt, wt, window_strides=(1, 1), padding=((1, 1), (1, 1)),
        dimension_numbers=("NCHW", "OIHW", "NCHW"),
        precision=jax.lax.Precision.HIGHEST)
    conv = conv.reshape(B, Cout, H // 2, 2, W // 2, 2)
    return conv.transpose(0, 1, 3, 5, 2, 4).reshape(B, 4 * Cout, H // 2, W // 2)


# --------------------------- main --------------------------------------------

if __name__ == "__main__":
    B, C, H, W = 2, 8, 16, 16            # channels -> channels//2, then unshuffle(2)

    key = jax.random.PRNGKey(0)
    kw, kx = jax.random.split(key)
    weight = 0.2 * jax.random.normal(kw, (C // 2, C, 3, 3), jnp.float32)
    x = jax.random.normal(kx, (B, C, H, W), jnp.float32)

    fwd = jax.jit(downsample_forward)
    out = jax.block_until_ready(fwd(x, weight))
    assert out.shape == (B, 2 * C, H // 2, W // 2), out.shape

    ref = jax.block_until_ready(ref_forward(x, weight))
    max_err = float(jnp.max(jnp.abs(out - ref)))
    # Kernel: exact bf16*bf16 products + f32 accumulation; reference: f32 conv on the
    # same bf16-truncated operands -> differences are accumulation-order noise only.
    assert bool(jnp.allclose(out, ref, atol=1e-2, rtol=1e-2)), f"max abs err {max_err}"

    print("KERNEL_OK")
</pallas_src>

<mosaic_0001>
module attributes {stable_mosaic.version = 11 : i64} {
  func.func @_downsample_kernel(%arg0: i32, %arg1: memref<9x4x8xbf16, #tpu.memory_space<vmem>>, %arg2: memref<1x4x8x90xbf16, #tpu.memory_space<vmem>>, %arg3: memref<1x4x4x8x8xf32, #tpu.memory_space<vmem>>) attributes {dimension_semantics = [#tpu.dimension_semantics<parallel>], iteration_bounds = array<i64: 2>, scalar_prefetch = 0 : i64, scratch_operands = 0 : i64, tpu.core_type = #tpu.core_type<tc>, window_params = [{pipeline_mode = #tpu.pipeline_mode<synchronous>, transform_indices = @transform_0, window_bounds = array<i64: 9, 4, 8>}, {transform_indices = @transform_1, window_bounds = array<i64: 1, 4, 8, 90>}, {transform_indices = @transform_2, window_bounds = array<i64: 1, 4, 4, 8, 8>}]} {
    %cst = arith.constant 0.000000e+00 : f32
    %0 = vector.broadcast %cst : f32 to vector<4x72xf32>
    %c0 = arith.constant 0 : index
    %c0_0 = arith.constant 0 : index
    %c0_1 = arith.constant 0 : index
    %c0_2 = arith.constant 0 : index
    %1 = vector.load %arg2[%c0, %c0_0, %c0_1, %c0_2] : memref<1x4x8x90xbf16, #tpu.memory_space<vmem>>, vector<1x1x8x72xbf16>
    %2 = vector.shape_cast %1 : vector<1x1x8x72xbf16> to vector<8x72xbf16>
    %c0_3 = arith.constant 0 : index
    %c0_4 = arith.constant 0 : index
    %c0_5 = arith.constant 0 : index
    %3 = vector.load %arg1[%c0_3, %c0_4, %c0_5] : memref<9x4x8xbf16, #tpu.memory_space<vmem>>, vector<1x4x8xbf16>
    %4 = vector.shape_cast %3 : vector<1x4x8xbf16> to vector<4x8xbf16>
    %cst_6 = arith.constant dense<0.000000e+00> : vector<4x72xf32>
    %5 = tpu.matmul %4, %2, %cst_6 {dimension_numbers = #tpu.dot_dimension_numbers<[1], [0], [0], [1], [0, 0, 1, 1], [], []>} : vector<4x8xbf16>, vector<8x72xbf16>, vector<4x72xf32> -> vector<4x72xf32>
    %6 = arith.addf %0, %5 : vector<4x72xf32>
    %c0_7 = arith.constant 0 : index
    %c1 = arith.constant 1 : index
    %c0_8 = arith.constant 0 : index
    %c0_9 = arith.constant 0 : index
    %7 = vector.load %arg2[%c0_7, %c1, %c0_8, %c0_9] : memref<1x4x8x90xbf16, #tpu.memory_space<vmem>>, vector<1x1x8x72xbf16>
    %8 = vector.shape_cast %7 : vector<1x1x8x72xbf16> to vector<8x72xbf16>
    %c1_10 = arith.constant 1 : index
    %c0_11 = arith.constant 0 : index
    %c0_12 = arith.constant 0 : index
    %9 = vector.load %arg1[%c1_10, %c0_11, %c0_12] : memref<9x4x8xbf16, #tpu.memory_space<vmem>>, vector<1x4x8xbf16>
    %10 = vector.shape_cast %9 : vector<1x4x8xbf16> to vector<4x8xbf16>
    %cst_13 = arith.constant dense<0.000000e+00> : vector<4x72xf32>
    %11 = tpu.matmul %10, %8, %cst_13 {dimension_numbers = #tpu.dot_dimension_numbers<[1], [0], [0], [1], [0, 0, 1, 1], [], []>} : vector<4x8xbf16>, vector<8x72xbf16>, vector<4x72xf32> -> vector<4x72xf32>
    %12 = arith.addf %6, %11 : vector<4x72xf32>
    %c0_14 = arith.constant 0 : index
    %c0_15 = arith.constant 0 : index
    %c0_16 = arith.constant 0 : index
    %c1_17 = arith.constant 1 : index
    %13 = vector.load %arg2[%c0_14, %c0_15, %c0_16, %c1_17] : memref<1x4x8x90xbf16, #tpu.memory_space<vmem>>, vector<1x1x8x72xbf16>
    %14 = vector.shape_cast %13 : vector<1x1x8x72xbf16> to vector<8x72xbf16>
    %c2 = arith.constant 2 : index
    %c0_18 = arith.constant 0 : index
    %c0_19 = arith.constant 0 : index
    %15 = vector.load %arg1[%c2, %c0_18, %c0_19] : memref<9x4x8xbf16, #tpu.memory_space<vmem>>, vector<1x4x8xbf16>
    %16 = vector.shape_cast %15 : vector<1x4x8xbf16> to vector<4x8xbf16>
    %cst_20 = arith.constant dense<0.000000e+00> : vector<4x72xf32>
    %17 = tpu.matmul %16, %14, %cst_20 {dimension_numbers = #tpu.dot_dimension_numbers<[1], [0], [0], [1], [0, 0, 1, 1], [], []>} : vector<4x8xbf16>, vector<8x72xbf16>, vector<4x72xf32> -> vector<4x72xf32>
    %18 = arith.addf %12, %17 : vector<4x72xf32>
    %c0_21 = arith.constant 0 : index
    %c2_22 = arith.constant 2 : index
    %c0_23 = arith.constant 0 : index
    %c0_24 = arith.constant 0 : index
    %19 = vector.load %arg2[%c0_21, %c2_22, %c0_23, %c0_24] : memref<1x4x8x90xbf16, #tpu.memory_space<vmem>>, vector<1x1x8x72xbf16>
    %20 = vector.shape_cast %19 : vector<1x1x8x72xbf16> to vector<8x72xbf16>
    %c3 = arith.constant 3 : index
    %c0_25 = arith.constant 0 : index
    %c0_26 = arith.constant 0 : index
    %21 = vector.load %arg1[%c3, %c0_25, %c0_26] : memref<9x4x8xbf16, #tpu.memory_space<vmem>>, vector<1x4x8xbf16>
    %22 = vector.shape_cast %21 : vector<1x4x8xbf16> to vector<4x8xbf16>
    %cst_27 = arith.constant dense<0.000000e+00> : vector<4x72xf32>
    %23 = tpu.matmul %22, %20, %cst_27 {dimension_numbers = #tpu.dot_dimension_numbers<[1], [0], [0], [1], [0, 0, 1, 1], [], []>} : vector<4x8xbf16>, vector<8x72xbf16>, vector<4x72xf32> -> vector<4x72xf32>
    %24 = arith.addf %18, %23 : vector<4x72xf32>
    %c0_28 = arith.constant 0 : index
    %c3_29 = arith.constant 3 : index
    %c0_30 = arith.constant 0 : index
    %c0_31 = arith.constant 0 : index
    %25 = vector.load %arg2[%c0_28, %c3_29, %c0_30, %c0_31] : memref<1x4x8x90xbf16, #tpu.memory_space<vmem>>, vector<1x1x8x72xbf16>
    %26 = vector.shape_cast %25 : vector<1x1x8x72xbf16> to vector<8x72xbf16>
    %c4 = arith.constant 4 : index
    %c0_32 = arith.constant 0 : index
    %c0_33 = arith.constant 0 : index
    %27 = vector.load %arg1[%c4, %c0_32, %c0_33] : memref<9x4x8xbf16, #tpu.memory_space<vmem>>, vector<1x4x8xbf16>
    %28 = vector.shape_cast %27 : vector<1x4x8xbf16> to vector<4x8xbf16>
    %cst_34 = arith.constant dense<0.000000e+00> : vector<4x72xf32>
    %29 = tpu.matmul %28, %26, %cst_34 {dimension_numbers = #tpu.dot_dimension_numbers<[1], [0], [0], [1], [0, 0, 1, 1], [], []>} : vector<4x8xbf16>, vector<8x72xbf16>, vector<4x72xf32> -> vector<4x72xf32>
    %30 = arith.addf %24, %29 : vector<4x72xf32>
    %c0_35 = arith.constant 0 : index
    %c2_36 = arith.constant 2 : index
    %c0_37 = arith.constant 0 : index
    %c1_38 = arith.constant 1 : index
    %31 = vector.load %arg2[%c0_35, %c2_36, %c0_37, %c1_38] : memref<1x4x8x90xbf16, #tpu.memory_space<vmem>>, vector<1x1x8x72xbf16>
    %32 = vector.shape_cast %31 : vector<1x1x8x72xbf16> to vector<8x72xbf16>
    %c5 = arith.constant 5 : index
    %c0_39 = arith.constant 0 : index
    %c0_40 = arith.constant 0 : index
    %33 = vector.load %arg1[%c5, %c0_39, %c0_40] : memref<9x4x8xbf16, #tpu.memory_space<vmem>>, vector<1x4x8xbf16>
    %34 = vector.shape_cast %33 : vector<1x4x8xbf16> to vector<4x8xbf16>
    %cst_41 = arith.constant dense<0.000000e+00> : vector<4x72xf32>
    %35 = tpu.matmul %34, %32, %cst_41 {dimension_numbers = #tpu.dot_dimension_numbers<[1], [0], [0], [1], [0, 0, 1, 1], [], []>} : vector<4x8xbf16>, vector<8x72xbf16>, vector<4x72xf32> -> vector<4x72xf32>
    %36 = arith.addf %30, %35 : vector<4x72xf32>
    %c0_42 = arith.constant 0 : index
    %c0_43 = arith.constant 0 : index
    %c0_44 = arith.constant 0 : index
    %c9 = arith.constant 9 : index
    %37 = vector.load %arg2[%c0_42, %c0_43, %c0_44, %c9] : memref<1x4x8x90xbf16, #tpu.memory_space<vmem>>, vector<1x1x8x72xbf16>
    %38 = vector.shape_cast %37 : vector<1x1x8x72xbf16> to vector<8x72xbf16>
    %c6 = arith.constant 6 : index
    %c0_45 = arith.constant 0 : index
    %c0_46 = arith.constant 0 : index
    %39 = vector.load %arg1[%c6, %c0_45, %c0_46] : memref<9x4x8xbf16, #tpu.memory_space<vmem>>, vector<1x4x8xbf16>
    %40 = vector.shape_cast %39 : vector<1x4x8xbf16> to vector<4x8xbf16>
    %cst_47 = arith.constant dense<0.000000e+00> : vector<4x72xf32>
    %41 = tpu.matmul %40, %38, %cst_47 {dimension_numbers = #tpu.dot_dimension_numbers<[1], [0], [0], [1], [0, 0, 1, 1], [], []>} : vector<4x8xbf16>, vector<8x72xbf16>, vector<4x72xf32> -> vector<4x72xf32>
    %42 = arith.addf %36, %41 : vector<4x72xf32>
    %c0_48 = arith.constant 0 : index
    %c1_49 = arith.constant 1 : index
    %c0_50 = arith.constant 0 : index
    %c9_51 = arith.constant 9 : index
    %43 = vector.load %arg2[%c0_48, %c1_49, %c0_50, %c9_51] : memref<1x4x8x90xbf16, #tpu.memory_space<vmem>>, vector<1x1x8x72xbf16>
    %44 = vector.shape_cast %43 : vector<1x1x8x72xbf16> to vector<8x72xbf16>
    %c7 = arith.constant 7 : index
    %c0_52 = arith.constant 0 : index
    %c0_53 = arith.constant 0 : index
    %45 = vector.load %arg1[%c7, %c0_52, %c0_53] : memref<9x4x8xbf16, #tpu.memory_space<vmem>>, vector<1x4x8xbf16>
    %46 = vector.shape_cast %45 : vector<1x4x8xbf16> to vector<4x8xbf16>
    %cst_54 = arith.constant dense<0.000000e+00> : vector<4x72xf32>
    %47 = tpu.matmul %46, %44, %cst_54 {dimension_numbers = #tpu.dot_dimension_numbers<[1], [0], [0], [1], [0, 0, 1, 1], [], []>} : vector<4x8xbf16>, vector<8x72xbf16>, vector<4x72xf32> -> vector<4x72xf32>
    %48 = arith.addf %42, %47 : vector<4x72xf32>
    %c0_55 = arith.constant 0 : index
    %c0_56 = arith.constant 0 : index
    %c0_57 = arith.constant 0 : index
    %c10 = arith.constant 10 : index
    %49 = vector.load %arg2[%c0_55, %c0_56, %c0_57, %c10] : memref<1x4x8x90xbf16, #tpu.memory_space<vmem>>, vector<1x1x8x72xbf16>
    %50 = vector.shape_cast %49 : vector<1x1x8x72xbf16> to vector<8x72xbf16>
    %c8 = arith.constant 8 : index
    %c0_58 = arith.constant 0 : index
    %c0_59 = arith.constant 0 : index
    %51 = vector.load %arg1[%c8, %c0_58, %c0_59] : memref<9x4x8xbf16, #tpu.memory_space<vmem>>, vector<1x4x8xbf16>
    %52 = vector.shape_cast %51 : vector<1x4x8xbf16> to vector<4x8xbf16>
    %cst_60 = arith.constant dense<0.000000e+00> : vector<4x72xf32>
    %53 = tpu.matmul %52, %50, %cst_60 {dimension_numbers = #tpu.dot_dimension_numbers<[1], [0], [0], [1], [0, 0, 1, 1], [], []>} : vector<4x8xbf16>, vector<8x72xbf16>, vector<4x72xf32> -> vector<4x72xf32>
    %54 = arith.addf %48, %53 : vector<4x72xf32>
    %55 = vector.extract_strided_slice %54 {offsets = [0, 0], sizes = [4, 8], strides = [1, 1]} : vector<4x72xf32> to vector<4x8xf32>
    %c0_61 = arith.constant 0 : index
    %c0_62 = arith.constant 0 : index
    %c0_63 = arith.constant 0 : index
    %c0_64 = arith.constant 0 : index
    %c0_65 = arith.constant 0 : index
    %56 = vector.load %arg3[%c0_61, %c0_62, %c0_63, %c0_64, %c0_65] : memref<1x4x4x8x8xf32, #tpu.memory_space<vmem>>, vector<1x4x1x1x8xf32>
    %57 = vector.shape_cast %56 : vector<1x4x1x1x8xf32> to vector<4x8xf32>
    %58 = vector.shape_cast %55 : vector<4x8xf32> to vector<1x4x1x1x8xf32>
    tpu.vector_store %arg3[%c0_61, %c0_62, %c0_63, %c0_64, %c0_65], %58 {strides = array<i32>} : memref<1x4x4x8x8xf32, #tpu.memory_space<vmem>>, vector<1x4x1x1x8xf32>,
    %59 = vector.extract_strided_slice %54 {offsets = [0, 9], sizes = [4, 8], strides = [1, 1]} : vector<4x72xf32> to vector<4x8xf32>
    %c0_66 = arith.constant 0 : index
    %c0_67 = arith.constant 0 : index
    %c0_68 = arith.constant 0 : index
    %c1_69 = arith.constant 1 : index
    %c0_70 = arith.constant 0 : index
    %60 = vector.load %arg3[%c0_66, %c0_67, %c0_68, %c1_69, %c0_70] : memref<1x4x4x8x8xf32, #tpu.memory_space<vmem>>, vector<1x4x1x1x8xf32>
    %61 = vector.shape_cast %60 : vector<1x4x1x1x8xf32> to vector<4x8xf32>
    %62 = vector.shape_cast %59 : vector<4x8xf32> to vector<1x4x1x1x8xf32>
    tpu.vector_store %arg3[%c0_66, %c0_67, %c0_68, %c1_69, %c0_70], %62 {strides = array<i32>} : memref<1x4x4x8x8xf32, #tpu.memory_space<vmem>>, vector<1x4x1x1x8xf32>,
    %63 = vector.extract_strided_slice %54 {offsets = [0, 18], sizes = [4, 8], strides = [1, 1]} : vector<4x72xf32> to vector<4x8xf32>
    %c0_71 = arith.constant 0 : index
    %c0_72 = arith.constant 0 : index
    %c0_73 = arith.constant 0 : index
    %c2_74 = arith.constant 2 : index
    %c0_75 = arith.constant 0 : index
    %64 = vector.load %arg3[%c0_71, %c0_72, %c0_73, %c2_74, %c0_75] : memref<1x4x4x8x8xf32, #tpu.memory_space<vmem>>, vector<1x4x1x1x8xf32>
    %65 = vector.shape_cast %64 : vector<1x4x1x1x8xf32> to vector<4x8xf32>
    %66 = vector.shape_cast %63 : vector<4x8xf32> to vector<1x4x1x1x8xf32>
    tpu.vector_store %arg3[%c0_71, %c0_72, %c0_73, %c2_74, %c0_75], %66 {strides = array<i32>} : memref<1x4x4x8x8xf32, #tpu.memory_space<vmem>>, vector<1x4x1x1x8xf32>,
    %67 = vector.extract_strided_slice %54 {offsets = [0, 27], sizes = [4, 8], strides = [1, 1]} : vector<4x72xf32> to vector<4x8xf32>
    %c0_76 = arith.constant 0 : index
    %c0_77 = arith.constant 0 : index
    %c0_78 = arith.constant 0 : index
    %c3_79 = arith.constant 3 : index
    %c0_80 = arith.constant 0 : index
    %68 = vector.load %arg3[%c0_76, %c0_77, %c0_78, %c3_79, %c0_80] : memref<1x4x4x8x8xf32, #tpu.memory_space<vmem>>, vector<1x4x1x1x8xf32>
    %69 = vector.shape_cast %68 : vector<1x4x1x1x8xf32> to vector<4x8xf32>
    %70 = vector.shape_cast %67 : vector<4x8xf32> to vector<1x4x1x1x8xf32>
    tpu.vector_store %arg3[%c0_76, %c0_77, %c0_78, %c3_79, %c0_80], %70 {strides = array<i32>} : memref<1x4x4x8x8xf32, #tpu.memory_space<vmem>>, vector<1x4x1x1x8xf32>,
    %71 = vector.extract_strided_slice %54 {offsets = [0, 36], sizes = [4, 8], strides = [1, 1]} : vector<4x72xf32> to vector<4x8xf32>
    %c0_81 = arith.constant 0 : index
    %c0_82 = arith.constant 0 : index
    %c0_83 = arith.constant 0 : index
    %c4_84 = arith.constant 4 : index
    %c0_85 = arith.constant 0 : index
    %72 = vector.load %arg3[%c0_81, %c0_82, %c0_83, %c4_84, %c0_85] : memref<1x4x4x8x8xf32, #tpu.memory_space<vmem>>, vector<1x4x1x1x8xf32>
    %73 = vector.shape_cast %72 : vector<1x4x1x1x8xf32> to vector<4x8xf32>
    %74 = vector.shape_cast %71 : vector<4x8xf32> to vector<1x4x1x1x8xf32>
    tpu.vector_store %arg3[%c0_81, %c0_82, %c0_83, %c4_84, %c0_85], %74 {strides = array<i32>} : memref<1x4x4x8x8xf32, #tpu.memory_space<vmem>>, vector<1x4x1x1x8xf32>,
    %75 = vector.extract_strided_slice %54 {offsets = [0, 45], sizes = [4, 8], strides = [1, 1]} : vector<4x72xf32> to vector<4x8xf32>
    %c0_86 = arith.constant 0 : index
    %c0_87 = arith.constant 0 : index
    %c0_88 = arith.constant 0 : index
    %c5_89 = arith.constant 5 : index
    %c0_90 = arith.constant 0 : index
    %76 = vector.load %arg3[%c0_86, %c0_87, %c0_88, %c5_89, %c0_90] : memref<1x4x4x8x8xf32, #tpu.memory_space<vmem>>, vector<1x4x1x1x8xf32>
    %77 = vector.shape_cast %76 : vector<1x4x1x1x8xf32> to vector<4x8xf32>
    %78 = vector.shape_cast %75 : vector<4x8xf32> to vector<1x4x1x1x8xf32>
    tpu.vector_store %arg3[%c0_86, %c0_87, %c0_88, %c5_89, %c0_90], %78 {strides = array<i32>} : memref<1x4x4x8x8xf32, #tpu.memory_space<vmem>>, vector<1x4x1x1x8xf32>,
    %79 = vector.extract_strided_slice %54 {offsets = [0, 54], sizes = [4, 8], strides = [1, 1]} : vector<4x72xf32> to vector<4x8xf32>
    %c0_91 = arith.constant 0 : index
    %c0_92 = arith.constant 0 : index
    %c0_93 = arith.constant 0 : index
    %c6_94 = arith.constant 6 : index
    %c0_95 = arith.constant 0 : index
    %80 = vector.load %arg3[%c0_91, %c0_92, %c0_93, %c6_94, %c0_95] : memref<1x4x4x8x8xf32, #tpu.memory_space<vmem>>, vector<1x4x1x1x8xf32>
    %81 = vector.shape_cast %80 : vector<1x4x1x1x8xf32> to vector<4x8xf32>
    %82 = vector.shape_cast %79 : vector<4x8xf32> to vector<1x4x1x1x8xf32>
    tpu.vector_store %arg3[%c0_91, %c0_92, %c0_93, %c6_94, %c0_95], %82 {strides = array<i32>} : memref<1x4x4x8x8xf32, #tpu.memory_space<vmem>>, vector<1x4x1x1x8xf32>,
    %83 = vector.extract_strided_slice %54 {offsets = [0, 63], sizes = [4, 8], strides = [1, 1]} : vector<4x72xf32> to vector<4x8xf32>
    %c0_96 = arith.constant 0 : index
    %c0_97 = arith.constant 0 : index
    %c0_98 = arith.constant 0 : index
    %c7_99 = arith.constant 7 : index
    %c0_100 = arith.constant 0 : index
    %84 = vector.load %arg3[%c0_96, %c0_97, %c0_98, %c7_99, %c0_100] : memref<1x4x4x8x8xf32, #tpu.memory_space<vmem>>, vector<1x4x1x1x8xf32>
    %85 = vector.shape_cast %84 : vector<1x4x1x1x8xf32> to vector<4x8xf32>
    %86 = vector.shape_cast %83 : vector<4x8xf32> to vector<1x4x1x1x8xf32>
    tpu.vector_store %arg3[%c0_96, %c0_97, %c0_98, %c7_99, %c0_100], %86 {strides = array<i32>} : memref<1x4x4x8x8xf32, #tpu.memory_space<vmem>>, vector<1x4x1x1x8xf32>,
    %cst_101 = arith.constant 0.000000e+00 : f32
    %87 = vector.broadcast %cst_101 : f32 to vector<4x72xf32>
    %c0_102 = arith.constant 0 : index
    %c1_103 = arith.constant 1 : index
    %c0_104 = arith.constant 0 : index
    %c0_105 = arith.constant 0 : index
    %88 = vector.load %arg2[%c0_102, %c1_103, %c0_104, %c0_105] : memref<1x4x8x90xbf16, #tpu.memory_space<vmem>>, vector<1x1x8x72xbf16>
    %89 = vector.shape_cast %88 : vector<1x1x8x72xbf16> to vector<8x72xbf16>
    %c0_106 = arith.constant 0 : index
    %c0_107 = arith.constant 0 : index
    %c0_108 = arith.constant 0 : index
    %90 = vector.load %arg1[%c0_106, %c0_107, %c0_108] : memref<9x4x8xbf16, #tpu.memory_space<vmem>>, vector<1x4x8xbf16>
    %91 = vector.shape_cast %90 : vector<1x4x8xbf16> to vector<4x8xbf16>
    %cst_109 = arith.constant dense<0.000000e+00> : vector<4x72xf32>
    %92 = tpu.matmul %91, %89, %cst_109 {dimension_numbers = #tpu.dot_dimension_numbers<[1], [0], [0], [1], [0, 0, 1, 1], [], []>} : vector<4x8xbf16>, vector<8x72xbf16>, vector<4x72xf32> -> vector<4x72xf32>
    %93 = arith.addf %87, %92 : vector<4x72xf32>
    %c0_110 = arith.constant 0 : index
    %c0_111 = arith.constant 0 : index
    %c0_112 = arith.constant 0 : index
    %c1_113 = arith.constant 1 : index
    %94 = vector.load %arg2[%c0_110, %c0_111, %c0_112, %c1_113] : memref<1x4x8x90xbf16, #tpu.memory_space<vmem>>, vector<1x1x8x72xbf16>
    %95 = vector.shape_cast %94 : vector<1x1x8x72xbf16> to vector<8x72xbf16>
    %c1_114 = arith.constant 1 : index
    %c0_115 = arith.constant 0 : index
    %c0_116 = arith.constant 0 : index
    %96 = vector.load %arg1[%c1_114, %c0_115, %c0_116] : memref<9x4x8xbf16, #tpu.memory_space<vmem>>, vector<1x4x8xbf16>
    %97 = vector.shape_cast %96 : vector<1x4x8xbf16> to vector<4x8xbf16>
    %cst_117 = arith.constant dense<0.000000e+00> : vector<4x72xf32>
    %98 = tpu.matmul %97, %95, %cst_117 {dimension_numbers = #tpu.dot_dimension_numbers<[1], [0], [0], [1], [0, 0, 1, 1], [], []>} : vector<4x8xbf16>, vector<8x72xbf16>, vector<4x72xf32> -> vector<4x72xf32>
    %99 = arith.addf %93, %98 : vector<4x72xf32>
    %c0_118 = arith.constant 0 : index
    %c1_119 = arith.constant 1 : index
    %c0_120 = arith.constant 0 : index
    %c1_121 = arith.constant 1 : index
    %100 = vector.load %arg2[%c0_118, %c1_119, %c0_120, %c1_121] : memref<1x4x8x90xbf16, #tpu.memory_space<vmem>>, vector<1x1x8x72xbf16>
    %101 = vector.shape_cast %100 : vector<1x1x8x72xbf16> to vector<8x72xbf16>
    %c2_122 = arith.constant 2 : index
    %c0_123 = arith.constant 0 : index
    %c0_124 = arith.constant 0 : index
    %102 = vector.load %arg1[%c2_122, %c0_123, %c0_124] : memref<9x4x8xbf16, #tpu.memory_space<vmem>>, vector<1x4x8xbf16>
    %103 = vector.shape_cast %102 : vector<1x4x8xbf16> to vector<4x8xbf16>
    %cst_125 = arith.constant dense<0.000000e+00> : vector<4x72xf32>
    %104 = tpu.matmul %103, %101, %cst_125 {dimension_numbers = #tpu.dot_dimension_numbers<[1], [0], [0], [1], [0, 0, 1, 1], [], []>} : vector<4x8xbf16>, vector<8x72xbf16>, vector<4x72xf32> -> vector<4x72xf32>
    %105 = arith.addf %99, %104 : vector<4x72xf32>
    %c0_126 = arith.constant 0 : index
    %c3_127 = arith.constant 3 : index
    %c0_128 = arith.constant 0 : index
    %c0_129 = arith.constant 0 : index
    %106 = vector.load %arg2[%c0_126, %c3_127, %c0_128, %c0_129] : memref<1x4x8x90xbf16, #tpu.memory_space<vmem>>, vector<1x1x8x72xbf16>
    %107 = vector.shape_cast %106 : vector<1x1x8x72xbf16> to vector<8x72xbf16>
    %c3_130 = arith.constant 3 : index
    %c0_131 = arith.constant 0 : index
    %c0_132 = arith.constant 0 : index
    %108 = vector.load %arg1[%c3_130, %c0_131, %c0_132] : memref<9x4x8xbf16, #tpu.memory_space<vmem>>, vector<1x4x8xbf16>
    %109 = vector.shape_cast %108 : vector<1x4x8xbf16> to vector<4x8xbf16>
    %cst_133 = arith.constant dense<0.000000e+00> : vector<4x72xf32>
    %110 = tpu.matmul %109, %107, %cst_133 {dimension_numbers = #tpu.dot_dimension_numbers<[1], [0], [0], [1], [0, 0, 1, 1], [], []>} : vector<4x8xbf16>, vector<8x72xbf16>, vector<4x72xf32> -> vector<4x72xf32>
    %111 = arith.addf %105, %110 : vector<4x72xf32>
    %c0_134 = arith.constant 0 : index
    %c2_135 = arith.constant 2 : index
    %c0_136 = arith.constant 0 : index
    %c1_137 = arith.constant 1 : index
    %112 = vector.load %arg2[%c0_134, %c2_135, %c0_136, %c1_137] : memref<1x4x8x90xbf16, #tpu.memory_space<vmem>>, vector<1x1x8x72xbf16>
    %113 = vector.shape_cast %112 : vector<1x1x8x72xbf16> to vector<8x72xbf16>
    %c4_138 = arith.constant 4 : index
    %c0_139 = arith.constant 0 : index
    %c0_140 = arith.constant 0 : index
    %114 = vector.load %arg1[%c4_138, %c0_139, %c0_140] : memref<9x4x8xbf16, #tpu.memory_space<vmem>>, vector<1x4x8xbf16>
    %115 = vector.shape_cast %114 : vector<1x4x8xbf16> to vector<4x8xbf16>
    %cst_141 = arith.constant dense<0.000000e+00> : vector<4x72xf32>
    %116 = tpu.matmul %115, %113, %cst_141 {dimension_numbers = #tpu.dot_dimension_numbers<[1], [0], [0], [1], [0, 0, 1, 1], [], []>} : vector<4x8xbf16>, vector<8x72xbf16>, vector<4x72xf32> -> vector<4x72xf32>
    %117 = arith.addf %111, %116 : vector<4x72xf32>
    %c0_142 = arith.constant 0 : index
    %c3_143 = arith.constant 3 : index
    %c0_144 = arith.constant 0 : index
    %c1_145 = arith.constant 1 : index
    %118 = vector.load %arg2[%c0_142, %c3_143, %c0_144, %c1_145] : memref<1x4x8x90xbf16, #tpu.memory_space<vmem>>, vector<1x1x8x72xbf16>
    %119 = vector.shape_cast %118 : vector<1x1x8x72xbf16> to vector<8x72xbf16>
    %c5_146 = arith.constant 5 : index
    %c0_147 = arith.constant 0 : index
    %c0_148 = arith.constant 0 : index
    %120 = vector.load %arg1[%c5_146, %c0_147, %c0_148] : memref<9x4x8xbf16, #tpu.memory_space<vmem>>, vector<1x4x8xbf16>
    %121 = vector.shape_cast %120 : vector<1x4x8xbf16> to vector<4x8xbf16>
    %cst_149 = arith.constant dense<0.000000e+00> : vector<4x72xf32>
    %122 = tpu.matmul %121, %119, %cst_149 {dimension_numbers = #tpu.dot_dimension_numbers<[1], [0], [0], [1], [0, 0, 1, 1], [], []>} : vector<4x8xbf16>, vector<8x72xbf16>, vector<4x72xf32> -> vector<4x72xf32>
    %123 = arith.addf %117, %122 : vector<4x72xf32>
    %c0_150 = arith.constant 0 : index
    %c1_151 = arith.constant 1 : index
    %c0_152 = arith.constant 0 : index
    %c9_153 = arith.constant 9 : index
    %124 = vector.load %arg2[%c0_150, %c1_151, %c0_152, %c9_153] : memref<1x4x8x90xbf16, #tpu.memory_space<vmem>>, vector<1x1x8x72xbf16>
    %125 = vector.shape_cast %124 : vector<1x1x8x72xbf16> to vector<8x72xbf16>
    %c6_154 = arith.constant 6 : index
    %c0_155 = arith.constant 0 : index
    %c0_156 = arith.constant 0 : index
    %126 = vector.load %arg1[%c6_154, %c0_155, %c0_156] : memref<9x4x8xbf16, #tpu.memory_space<vmem>>, vector<1x4x8xbf16>
    %127 = vector.shape_cast %126 : vector<1x4x8xbf16> to vector<4x8xbf16>
    %cst_157 = arith.constant dense<0.000000e+00> : vector<4x72xf32>
    %128 = tpu.matmul %127, %125, %cst_157 {dimension_numbers = #tpu.dot_dimension_numbers<[1], [0], [0], [1], [0, 0, 1, 1], [], []>} : vector<4x8xbf16>, vector<8x72xbf16>, vector<4x72xf32> -> vector<4x72xf32>
    %129 = arith.addf %123, %128 : vector<4x72xf32>
    %c0_158 = arith.constant 0 : index
    %c0_159 = arith.constant 0 : index
    %c0_160 = arith.constant 0 : index
    %c10_161 = arith.constant 10 : index
    %130 = vector.load %arg2[%c0_158, %c0_159, %c0_160, %c10_161] : memref<1x4x8x90xbf16, #tpu.memory_space<vmem>>, vector<1x1x8x72xbf16>
    %131 = vector.shape_cast %130 : vector<1x1x8x72xbf16> to vector<8x72xbf16>
    %c7_162 = arith.constant 7 : index
    %c0_163 = arith.constant 0 : index
    %c0_164 = arith.constant 0 : index
    %132 = vector.load %arg1[%c7_162, %c0_163, %c0_164] : memref<9x4x8xbf16, #tpu.memory_space<vmem>>, vector<1x4x8xbf16>
    %133 = vector.shape_cast %132 : vector<1x4x8xbf16> to vector<4x8xbf16>
    %cst_165 = arith.constant dense<0.000000e+00> : vector<4x72xf32>
    %134 = tpu.matmul %133, %131, %cst_165 {dimension_numbers = #tpu.dot_dimension_numbers<[1], [0], [0], [1], [0, 0, 1, 1], [], []>} : vector<4x8xbf16>, vector<8x72xbf16>, vector<4x72xf32> -> vector<4x72xf32>
    %135 = arith.addf %129, %134 : vector<4x72xf32>
    %c0_166 = arith.constant 0 : index
    %c1_167 = arith.constant 1 : index
    %c0_168 = arith.constant 0 : index
    %c10_169 = arith.constant 10 : index
    %136 = vector.load %arg2[%c0_166, %c1_167, %c0_168, %c10_169] : memref<1x4x8x90xbf16, #tpu.memory_space<vmem>>, vector<1x1x8x72xbf16>
    %137 = vector.shape_cast %136 : vector<1x1x8x72xbf16> to vector<8x72xbf16>
    %c8_170 = arith.constant 8 : index
    %c0_171 = arith.constant 0 : index
    %c0_172 = arith.constant 0 : index
    %138 = vector.load %arg1[%c8_170, %c0_171, %c0_172] : memref<9x4x8xbf16, #tpu.memory_space<vmem>>, vector<1x4x8xbf16>
    %139 = vector.shape_cast %138 : vector<1x4x8xbf16> to vector<4x8xbf16>
    %cst_173 = arith.constant dense<0.000000e+00> : vector<4x72xf32>
    %140 = tpu.matmul %139, %137, %cst_173 {dimension_numbers = #tpu.dot_dimension_numbers<[1], [0], [0], [1], [0, 0, 1, 1], [], []>} : vector<4x8xbf16>, vector<8x72xbf16>, vector<4x72xf32> -> vector<4x72xf32>
    %141 = arith.addf %135, %140 : vector<4x72xf32>
    %142 = vector.extract_strided_slice %141 {offsets = [0, 0], sizes = [4, 8], strides = [1, 1]} : vector<4x72xf32> to vector<4x8xf32>
    %c0_174 = arith.constant 0 : index
    %c0_175 = arith.constant 0 : index
    %c1_176 = arith.constant 1 : index
    %c0_177 = arith.constant 0 : index
    %c0_178 = arith.constant 0 : index
    %143 = vector.load %arg3[%c0_174, %c0_175, %c1_176, %c0_177, %c0_178] : memref<1x4x4x8x8xf32, #tpu.memory_space<vmem>>, vector<1x4x1x1x8xf32>
    %144 = vector.shape_cast %143 : vector<1x4x1x1x8xf32> to vector<4x8xf32>
    %145 = vector.shape_cast %142 : vector<4x8xf32> to vector<1x4x1x1x8xf32>
    tpu.vector_store %arg3[%c0_174, %c0_175, %c1_176, %c0_177, %c0_178], %145 {strides = array<i32>} : memref<1x4x4x8x8xf32, #tpu.memory_space<vmem>>, vector<1x4x1x1x8xf32>,
    %146 = vector.extract_strided_slice %141 {offsets = [0, 9], sizes = [4, 8], strides = [1, 1]} : vector<4x72xf32> to vector<4x8xf32>
    %c0_179 = arith.constant 0 : index
    %c0_180 = arith.constant 0 : index
    %c1_181 = arith.constant 1 : index
    %c1_182 = arith.constant 1 : index
    %c0_183 = arith.constant 0 : index
    %147 = vector.load %arg3[%c0_179, %c0_180, %c1_181, %c1_182, %c0_183] : memref<1x4x4x8x8xf32, #tpu.memory_space<vmem>>, vector<1x4x1x1x8xf32>
    %148 = vector.shape_cast %147 : vector<1x4x1x1x8xf32> to vector<4x8xf32>
    %149 = vector.shape_cast %146 : vector<4x8xf32> to vector<1x4x1x1x8xf32>
    tpu.vector_store %arg3[%c0_179, %c0_180, %c1_181, %c1_182, %c0_183], %149 {strides = array<i32>} : memref<1x4x4x8x8xf32, #tpu.memory_space<vmem>>, vector<1x4x1x1x8xf32>,
    %150 = vector.extract_strided_slice %141 {offsets = [0, 18], sizes = [4, 8], strides = [1, 1]} : vector<4x72xf32> to vector<4x8xf32>
    %c0_184 = arith.constant 0 : index
    %c0_185 = arith.constant 0 : index
    %c1_186 = arith.constant 1 : index
    %c2_187 = arith.constant 2 : index
    %c0_188 = arith.constant 0 : index
    %151 = vector.load %arg3[%c0_184, %c0_185, %c1_186, %c2_187, %c0_188] : memref<1x4x4x8x8xf32, #tpu.memory_space<vmem>>, vector<1x4x1x1x8xf32>
    %152 = vector.shape_cast %151 : vector<1x4x1x1x8xf32> to vector<4x8xf32>
    %153 = vector.shape_cast %150 : vector<4x8xf32> to vector<1x4x1x1x8xf32>
    tpu.vector_store %arg3[%c0_184, %c0_185, %c1_186, %c2_187, %c0_188], %153 {strides = array<i32>} : memref<1x4x4x8x8xf32, #tpu.memory_space<vmem>>, vector<1x4x1x1x8xf32>,
    %154 = vector.extract_strided_slice %141 {offsets = [0, 27], sizes = [4, 8], strides = [1, 1]} : vector<4x72xf32> to vector<4x8xf32>
    %c0_189 = arith.constant 0 : index
    %c0_190 = arith.constant 0 : index
    %c1_191 = arith.constant 1 : index
    %c3_192 = arith.constant 3 : index
    %c0_193 = arith.constant 0 : index
    %155 = vector.load %arg3[%c0_189, %c0_190, %c1_191, %c3_192, %c0_193] : memref<1x4x4x8x8xf32, #tpu.memory_space<vmem>>, vector<1x4x1x1x8xf32>
    %156 = vector.shape_cast %155 : vector<1x4x1x1x8xf32> to vector<4x8xf32>
    %157 = vector.shape_cast %154 : vector<4x8xf32> to vector<1x4x1x1x8xf32>
    tpu.vector_store %arg3[%c0_189, %c0_190, %c1_191, %c3_192, %c0_193], %157 {strides = array<i32>} : memref<1x4x4x8x8xf32, #tpu.memory_space<vmem>>, vector<1x4x1x1x8xf32>,
    %158 = vector.extract_strided_slice %141 {offsets = [0, 36], sizes = [4, 8], strides = [1, 1]} : vector<4x72xf32> to vector<4x8xf32>
    %c0_194 = arith.constant 0 : index
    %c0_195 = arith.constant 0 : index
    %c1_196 = arith.constant 1 : index
    %c4_197 = arith.constant 4 : index
    %c0_198 = arith.constant 0 : index
    %159 = vector.load %arg3[%c0_194, %c0_195, %c1_196, %c4_197, %c0_198] : memref<1x4x4x8x8xf32, #tpu.memory_space<vmem>>, vector<1x4x1x1x8xf32>
    %160 = vector.shape_cast %159 : vector<1x4x1x1x8xf32> to vector<4x8xf32>
    %161 = vector.shape_cast %158 : vector<4x8xf32> to vector<1x4x1x1x8xf32>
    tpu.vector_store %arg3[%c0_194, %c0_195, %c1_196, %c4_197, %c0_198], %161 {strides = array<i32>} : memref<1x4x4x8x8xf32, #tpu.memory_space<vmem>>, vector<1x4x1x1x8xf32>,
    %162 = vector.extract_strided_slice %141 {offsets = [0, 45], sizes = [4, 8], strides = [1, 1]} : vector<4x72xf32> to vector<4x8xf32>
    %c0_199 = arith.constant 0 : index
    %c0_200 = arith.constant 0 : index
    %c1_201 = arith.constant 1 : index
    %c5_202 = arith.constant 5 : index
    %c0_203 = arith.constant 0 : index
    %163 = vector.load %arg3[%c0_199, %c0_200, %c1_201, %c5_202, %c0_203] : memref<1x4x4x8x8xf32, #tpu.memory_space<vmem>>, vector<1x4x1x1x8xf32>
    %164 = vector.shape_cast %163 : vector<1x4x1x1x8xf32> to vector<4x8xf32>
    %165 = vector.shape_cast %162 : vector<4x8xf32> to vector<1x4x1x1x8xf32>
    tpu.vector_store %arg3[%c0_199, %c0_200, %c1_201, %c5_202, %c0_203], %165 {strides = array<i32>} : memref<1x4x4x8x8xf32, #tpu.memory_space<vmem>>, vector<1x4x1x1x8xf32>,
    %166 = vector.extract_strided_slice %141 {offsets = [0, 54], sizes = [4, 8], strides = [1, 1]} : vector<4x72xf32> to vector<4x8xf32>
    %c0_204 = arith.constant 0 : index
    %c0_205 = arith.constant 0 : index
    %c1_206 = arith.constant 1 : index
    %c6_207 = arith.constant 6 : index
    %c0_208 = arith.constant 0 : index
    %167 = vector.load %arg3[%c0_204, %c0_205, %c1_206, %c6_207, %c0_208] : memref<1x4x4x8x8xf32, #tpu.memory_space<vmem>>, vector<1x4x1x1x8xf32>
    %168 = vector.shape_cast %167 : vector<1x4x1x1x8xf32> to vector<4x8xf32>
    %169 = vector.shape_cast %166 : vector<4x8xf32> to vector<1x4x1x1x8xf32>
    tpu.vector_store %arg3[%c0_204, %c0_205, %c1_206, %c6_207, %c0_208], %169 {strides = array<i32>} : memref<1x4x4x8x8xf32, #tpu.memory_space<vmem>>, vector<1x4x1x1x8xf32>,
    %170 = vector.extract_strided_slice %141 {offsets = [0, 63], sizes = [4, 8], strides = [1, 1]} : vector<4x72xf32> to vector<4x8xf32>
    %c0_209 = arith.constant 0 : index
    %c0_210 = arith.constant 0 : index
    %c1_211 = arith.constant 1 : index
    %c7_212 = arith.constant 7 : index
    %c0_213 = arith.constant 0 : index
    %171 = vector.load %arg3[%c0_209, %c0_210, %c1_211, %c7_212, %c0_213] : memref<1x4x4x8x8xf32, #tpu.memory_space<vmem>>, vector<1x4x1x1x8xf32>
    %172 = vector.shape_cast %171 : vector<1x4x1x1x8xf32> to vector<4x8xf32>
    %173 = vector.shape_cast %170 : vector<4x8xf32> to vector<1x4x1x1x8xf32>
    tpu.vector_store %arg3[%c0_209, %c0_210, %c1_211, %c7_212, %c0_213], %173 {strides = array<i32>} : memref<1x4x4x8x8xf32, #tpu.memory_space<vmem>>, vector<1x4x1x1x8xf32>,
    %cst_214 = arith.constant 0.000000e+00 : f32
    %174 = vector.broadcast %cst_214 : f32 to vector<4x72xf32>
    %c0_215 = arith.constant 0 : index
    %c2_216 = arith.constant 2 : index
    %c0_217 = arith.constant 0 : index
    %c0_218 = arith.constant 0 : index
    %175 = vector.load %arg2[%c0_215, %c2_216, %c0_217, %c0_218] : memref<1x4x8x90xbf16, #tpu.memory_space<vmem>>, vector<1x1x8x72xbf16>
    %176 = vector.shape_cast %175 : vector<1x1x8x72xbf16> to vector<8x72xbf16>
    %c0_219 = arith.constant 0 : index
    %c0_220 = arith.constant 0 : index
    %c0_221 = arith.constant 0 : index
    %177 = vector.load %arg1[%c0_219, %c0_220, %c0_221] : memref<9x4x8xbf16, #tpu.memory_space<vmem>>, vector<1x4x8xbf16>
    %178 = vector.shape_cast %177 : vector<1x4x8xbf16> to vector<4x8xbf16>
    %cst_222 = arith.constant dense<0.000000e+00> : vector<4x72xf32>
    %179 = tpu.matmul %178, %176, %cst_222 {dimension_numbers = #tpu.dot_dimension_numbers<[1], [0], [0], [1], [0, 0, 1, 1], [], []>} : vector<4x8xbf16>, vector<8x72xbf16>, vector<4x72xf32> -> vector<4x72xf32>
    %180 = arith.addf %174, %179 : vector<4x72xf32>
    %c0_223 = arith.constant 0 : index
    %c3_224 = arith.constant 3 : index
    %c0_225 = arith.constant 0 : index
    %c0_226 = arith.constant 0 : index
    %181 = vector.load %arg2[%c0_223, %c3_224, %c0_225, %c0_226] : memref<1x4x8x90xbf16, #tpu.memory_space<vmem>>, vector<1x1x8x72xbf16>
    %182 = vector.shape_cast %181 : vector<1x1x8x72xbf16> to vector<8x72xbf16>
    %c1_227 = arith.constant 1 : index
    %c0_228 = arith.constant 0 : index
    %c0_229 = arith.constant 0 : index
    %183 = vector.load %arg1[%c1_227, %c0_228, %c0_229] : memref<9x4x8xbf16, #tpu.memory_space<vmem>>, vector<1x4x8xbf16>
    %184 = vector.shape_cast %183 : vector<1x4x8xbf16> to vector<4x8xbf16>
    %cst_230 = arith.constant dense<0.000000e+00> : vector<4x72xf32>
    %185 = tpu.matmul %184, %182, %cst_230 {dimension_numbers = #tpu.dot_dimension_numbers<[1], [0], [0], [1], [0, 0, 1, 1], [], []>} : vector<4x8xbf16>, vector<8x72xbf16>, vector<4x72xf32> -> vector<4x72xf32>
    %186 = arith.addf %180, %185 : vector<4x72xf32>
    %c0_231 = arith.constant 0 : index
    %c2_232 = arith.constant 2 : index
    %c0_233 = arith.constant 0 : index
    %c1_234 = arith.constant 1 : index
    %187 = vector.load %arg2[%c0_231, %c2_232, %c0_233, %c1_234] : memref<1x4x8x90xbf16, #tpu.memory_space<vmem>>, vector<1x1x8x72xbf16>
    %188 = vector.shape_cast %187 : vector<1x1x8x72xbf16> to vector<8x72xbf16>
    %c2_235 = arith.constant 2 : index
    %c0_236 = arith.constant 0 : index
    %c0_237 = arith.constant 0 : index
    %189 = vector.load %arg1[%c2_235, %c0_236, %c0_237] : memref<9x4x8xbf16, #tpu.memory_space<vmem>>, vector<1x4x8xbf16>
    %190 = vector.shape_cast %189 : vector<1x4x8xbf16> to vector<4x8xbf16>
    %cst_238 = arith.constant dense<0.000000e+00> : vector<4x72xf32>
    %191 = tpu.matmul %190, %188, %cst_238 {dimension_numbers = #tpu.dot_dimension_numbers<[1], [0], [0], [1], [0, 0, 1, 1], [], []>} : vector<4x8xbf16>, vector<8x72xbf16>, vector<4x72xf32> -> vector<4x72xf32>
    %192 = arith.addf %186, %191 : vector<4x72xf32>
    %c0_239 = arith.constant 0 : index
    %c0_240 = arith.constant 0 : index
    %c0_241 = arith.constant 0 : index
    %c9_242 = arith.constant 9 : index
    %193 = vector.load %arg2[%c0_239, %c0_240, %c0_241, %c9_242] : memref<1x4x8x90xbf16, #tpu.memory_space<vmem>>, vector<1x1x8x72xbf16>
    %194 = vector.shape_cast %193 : vector<1x1x8x72xbf16> to vector<8x72xbf16>
    %c3_243 = arith.constant 3 : index
    %c0_244 = arith.constant 0 : index
    %c0_245 = arith.constant 0 : index
    %195 = vector.load %arg1[%c3_243, %c0_244, %c0_245] : memref<9x4x8xbf16, #tpu.memory_space<vmem>>, vector<1x4x8xbf16>
    %196 = vector.shape_cast %195 : vector<1x4x8xbf16> to vector<4x8xbf16>
    %cst_246 = arith.constant dense<0.000000e+00> : vector<4x72xf32>
    %197 = tpu.matmul %196, %194, %cst_246 {dimension_numbers = #tpu.dot_dimension_numbers<[1], [0], [0], [1], [0, 0, 1, 1], [], []>} : vector<4x8xbf16>, vector<8x72xbf16>, vector<4x72xf32> -> vector<4x72xf32>
    %198 = arith.addf %192, %197 : vector<4x72xf32>
    %c0_247 = arith.constant 0 : index
    %c1_248 = arith.constant 1 : index
    %c0_249 = arith.constant 0 : index
    %c9_250 = arith.constant 9 : index
    %199 = vector.load %arg2[%c0_247, %c1_248, %c0_249, %c9_250] : memref<1x4x8x90xbf16, #tpu.memory_space<vmem>>, vector<1x1x8x72xbf16>
    %200 = vector.shape_cast %199 : vector<1x1x8x72xbf16> to vector<8x72xbf16>
    %c4_251 = arith.constant 4 : index
    %c0_252 = arith.constant 0 : index
    %c0_253 = arith.constant 0 : index
    %201 = vector.load %arg1[%c4_251, %c0_252, %c0_253] : memref<9x4x8xbf16, #tpu.memory_space<vmem>>, vector<1x4x8xbf16>
    %202 = vector.shape_cast %201 : vector<1x4x8xbf16> to vector<4x8xbf16>
    %cst_254 = arith.constant dense<0.000000e+00> : vector<4x72xf32>
    %203 = tpu.matmul %202, %200, %cst_254 {dimension_numbers = #tpu.dot_dimension_numbers<[1], [0], [0], [1], [0, 0, 1, 1], [], []>} : vector<4x8xbf16>, vector<8x72xbf16>, vector<4x72xf32> -> vector<4x72xf32>
    %204 = arith.addf %198, %203 : vector<4x72xf32>
    %c0_255 = arith.constant 0 : index
    %c0_256 = arith.constant 0 : index
    %c0_257 = arith.constant 0 : index
    %c10_258 = arith.constant 10 : index
    %205 = vector.load %arg2[%c0_255, %c0_256, %c0_257, %c10_258] : memref<1x4x8x90xbf16, #tpu.memory_space<vmem>>, vector<1x1x8x72xbf16>
    %206 = vector.shape_cast %205 : vector<1x1x8x72xbf16> to vector<8x72xbf16>
    %c5_259 = arith.constant 5 : index
    %c0_260 = arith.constant 0 : index
    %c0_261 = arith.constant 0 : index
    %207 = vector.load %arg1[%c5_259, %c0_260, %c0_261] : memref<9x4x8xbf16, #tpu.memory_space<vmem>>, vector<1x4x8xbf16>
    %208 = vector.shape_cast %207 : vector<1x4x8xbf16> to vector<4x8xbf16>
    %cst_262 = arith.constant dense<0.000000e+00> : vector<4x72xf32>
    %209 = tpu.matmul %208, %206, %cst_262 {dimension_numbers = #tpu.dot_dimension_numbers<[1], [0], [0], [1], [0, 0, 1, 1], [], []>} : vector<4x8xbf16>, vector<8x72xbf16>, vector<4x72xf32> -> vector<4x72xf32>
    %210 = arith.addf %204, %209 : vector<4x72xf32>
    %c0_263 = arith.constant 0 : index
    %c2_264 = arith.constant 2 : index
    %c0_265 = arith.constant 0 : index
    %c9_266 = arith.constant 9 : index
    %211 = vector.load %arg2[%c0_263, %c2_264, %c0_265, %c9_266] : memref<1x4x8x90xbf16, #tpu.memory_space<vmem>>, vector<1x1x8x72xbf16>
    %212 = vector.shape_cast %211 : vector<1x1x8x72xbf16> to vector<8x72xbf16>
    %c6_267 = arith.constant 6 : index
    %c0_268 = arith.constant 0 : index
    %c0_269 = arith.constant 0 : index
    %213 = vector.load %arg1[%c6_267, %c0_268, %c0_269] : memref<9x4x8xbf16, #tpu.memory_space<vmem>>, vector<1x4x8xbf16>
    %214 = vector.shape_cast %213 : vector<1x4x8xbf16> to vector<4x8xbf16>
    %cst_270 = arith.constant dense<0.000000e+00> : vector<4x72xf32>
    %215 = tpu.matmul %214, %212, %cst_270 {dimension_numbers = #tpu.dot_dimension_numbers<[1], [0], [0], [1], [0, 0, 1, 1], [], []>} : vector<4x8xbf16>, vector<8x72xbf16>, vector<4x72xf32> -> vector<4x72xf32>
    %216 = arith.addf %210, %215 : vector<4x72xf32>
    %c0_271 = arith.constant 0 : index
    %c3_272 = arith.constant 3 : index
    %c0_273 = arith.constant 0 : index
    %c9_274 = arith.constant 9 : index
    %217 = vector.load %arg2[%c0_271, %c3_272, %c0_273, %c9_274] : memref<1x4x8x90xbf16, #tpu.memory_space<vmem>>, vector<1x1x8x72xbf16>
    %218 = vector.shape_cast %217 : vector<1x1x8x72xbf16> to vector<8x72xbf16>
    %c7_275 = arith.constant 7 : index
    %c0_276 = arith.constant 0 : index
    %c0_277 = arith.constant 0 : index
    %219 = vector.load %arg1[%c7_275, %c0_276, %c0_277] : memref<9x4x8xbf16, #tpu.memory_space<vmem>>, vector<1x4x8xbf16>
    %220 = vector.shape_cast %219 : vector<1x4x8xbf16> to vector<4x8xbf16>
    %cst_278 = arith.constant dense<0.000000e+00> : vector<4x72xf32>
    %221 = tpu.matmul %220, %218, %cst_278 {dimension_numbers = #tpu.dot_dimension_numbers<[1], [0], [0], [1], [0, 0, 1, 1], [], []>} : vector<4x8xbf16>, vector<8x72xbf16>, vector<4x72xf32> -> vector<4x72xf32>
    %222 = arith.addf %216, %221 : vector<4x72xf32>
    %c0_279 = arith.constant 0 : index
    %c2_280 = arith.constant 2 : index
    %c0_281 = arith.constant 0 : index
    %c10_282 = arith.constant 10 : index
    %223 = vector.load %arg2[%c0_279, %c2_280, %c0_281, %c10_282] : memref<1x4x8x90xbf16, #tpu.memory_space<vmem>>, vector<1x1x8x72xbf16>
    %224 = vector.shape_cast %223 : vector<1x1x8x72xbf16> to vector<8x72xbf16>
    %c8_283 = arith.constant 8 : index
    %c0_284 = arith.constant 0 : index
    %c0_285 = arith.constant 0 : index
    %225 = vector.load %arg1[%c8_283, %c0_284, %c0_285] : memref<9x4x8xbf16, #tpu.memory_space<vmem>>, vector<1x4x8xbf16>
    %226 = vector.shape_cast %225 : vector<1x4x8xbf16> to vector<4x8xbf16>
    %cst_286 = arith.constant dense<0.000000e+00> : vector<4x72xf32>
    %227 = tpu.matmul %226, %224, %cst_286 {dimension_numbers = #tpu.dot_dimension_numbers<[1], [0], [0], [1], [0, 0, 1, 1], [], []>} : vector<4x8xbf16>, vector<8x72xbf16>, vector<4x72xf32> -> vector<4x72xf32>
    %228 = arith.addf %222, %227 : vector<4x72xf32>
    %229 = vector.extract_strided_slice %228 {offsets = [0, 0], sizes = [4, 8], strides = [1, 1]} : vector<4x72xf32> to vector<4x8xf32>
    %c0_287 = arith.constant 0 : index
    %c0_288 = arith.constant 0 : index
    %c2_289 = arith.constant 2 : index
    %c0_290 = arith.constant 0 : index
    %c0_291 = arith.constant 0 : index
    %230 = vector.load %arg3[%c0_287, %c0_288, %c2_289, %c0_290, %c0_291] : memref<1x4x4x8x8xf32, #tpu.memory_space<vmem>>, vector<1x4x1x1x8xf32>
    %231 = vector.shape_cast %230 : vector<1x4x1x1x8xf32> to vector<4x8xf32>
    %232 = vector.shape_cast %229 : vector<4x8xf32> to vector<1x4x1x1x8xf32>
    tpu.vector_store %arg3[%c0_287, %c0_288, %c2_289, %c0_290, %c0_291], %232 {strides = array<i32>} : memref<1x4x4x8x8xf32, #tpu.memory_space<vmem>>, vector<1x4x1x1x8xf32>,
    %233 = vector.extract_strided_slice %228 {offsets = [0, 9], sizes = [4, 8], strides = [1, 1]} : vector<4x72xf32> to vector<4x8xf32>
    %c0_292 = arith.constant 0 : index
    %c0_293 = arith.constant 0 : index
    %c2_294 = arith.constant 2 : index
    %c1_295 = arith.constant 1 : index
    %c0_296 = arith.constant 0 : index
    %234 = vector.load %arg3[%c0_292, %c0_293, %c2_294, %c1_295, %c0_296] : memref<1x4x4x8x8xf32, #tpu.memory_space<vmem>>, vector<1x4x1x1x8xf32>
    %235 = vector.shape_cast %234 : vector<1x4x1x1x8xf32> to vector<4x8xf32>
    %236 = vector.shape_cast %233 : vector<4x8xf32> to vector<1x4x1x1x8xf32>
    tpu.vector_store %arg3[%c0_292, %c0_293, %c2_294, %c1_295, %c0_296], %236 {strides = array<i32>} : memref<1x4x4x8x8xf32, #tpu.memory_space<vmem>>, vector<1x4x1x1x8xf32>,
    %237 = vector.extract_strided_slice %228 {offsets = [0, 18], sizes = [4, 8], strides = [1, 1]} : vector<4x72xf32> to vector<4x8xf32>
    %c0_297 = arith.constant 0 : index
    %c0_298 = arith.constant 0 : index
    %c2_299 = arith.constant 2 : index
    %c2_300 = arith.constant 2 : index
    %c0_301 = arith.constant 0 : index
    %238 = vector.load %arg3[%c0_297, %c0_298, %c2_299, %c2_300, %c0_301] : memref<1x4x4x8x8xf32, #tpu.memory_space<vmem>>, vector<1x4x1x1x8xf32>
    %239 = vector.shape_cast %238 : vector<1x4x1x1x8xf32> to vector<4x8xf32>
    %240 = vector.shape_cast %237 : vector<4x8xf32> to vector<1x4x1x1x8xf32>
    tpu.vector_store %arg3[%c0_297, %c0_298, %c2_299, %c2_300, %c0_301], %240 {strides = array<i32>} : memref<1x4x4x8x8xf32, #tpu.memory_space<vmem>>, vector<1x4x1x1x8xf32>,
    %241 = vector.extract_strided_slice %228 {offsets = [0, 27], sizes = [4, 8], strides = [1, 1]} : vector<4x72xf32> to vector<4x8xf32>
    %c0_302 = arith.constant 0 : index
    %c0_303 = arith.constant 0 : index
    %c2_304 = arith.constant 2 : index
    %c3_305 = arith.constant 3 : index
    %c0_306 = arith.constant 0 : index
    %242 = vector.load %arg3[%c0_302, %c0_303, %c2_304, %c3_305, %c0_306] : memref<1x4x4x8x8xf32, #tpu.memory_space<vmem>>, vector<1x4x1x1x8xf32>
    %243 = vector.shape_cast %242 : vector<1x4x1x1x8xf32> to vector<4x8xf32>
    %244 = vector.shape_cast %241 : vector<4x8xf32> to vector<1x4x1x1x8xf32>
    tpu.vector_store %arg3[%c0_302, %c0_303, %c2_304, %c3_305, %c0_306], %244 {strides = array<i32>} : memref<1x4x4x8x8xf32, #tpu.memory_space<vmem>>, vector<1x4x1x1x8xf32>,
    %245 = vector.extract_strided_slice %228 {offsets = [0, 36], sizes = [4, 8], strides = [1, 1]} : vector<4x72xf32> to vector<4x8xf32>
    %c0_307 = arith.constant 0 : index
    %c0_308 = arith.constant 0 : index
    %c2_309 = arith.constant 2 : index
    %c4_310 = arith.constant 4 : index
    %c0_311 = arith.constant 0 : index
    %246 = vector.load %arg3[%c0_307, %c0_308, %c2_309, %c4_310, %c0_311] : memref<1x4x4x8x8xf32, #tpu.memory_space<vmem>>, vector<1x4x1x1x8xf32>
    %247 = vector.shape_cast %246 : vector<1x4x1x1x8xf32> to vector<4x8xf32>
    %248 = vector.shape_cast %245 : vector<4x8xf32> to vector<1x4x1x1x8xf32>
    tpu.vector_store %arg3[%c0_307, %c0_308, %c2_309, %c4_310, %c0_311], %248 {strides = array<i32>} : memref<1x4x4x8x8xf32, #tpu.memory_space<vmem>>, vector<1x4x1x1x8xf32>,
    %249 = vector.extract_strided_slice %228 {offsets = [0, 45], sizes = [4, 8], strides = [1, 1]} : vector<4x72xf32> to vector<4x8xf32>
    %c0_312 = arith.constant 0 : index
    %c0_313 = arith.constant 0 : index
    %c2_314 = arith.constant 2 : index
    %c5_315 = arith.constant 5 : index
    %c0_316 = arith.constant 0 : index
    %250 = vector.load %arg3[%c0_312, %c0_313, %c2_314, %c5_315, %c0_316] : memref<1x4x4x8x8xf32, #tpu.memory_space<vmem>>, vector<1x4x1x1x8xf32>
    %251 = vector.shape_cast %250 : vector<1x4x1x1x8xf32> to vector<4x8xf32>
    %252 = vector.shape_cast %249 : vector<4x8xf32> to vector<1x4x1x1x8xf32>
    tpu.vector_store %arg3[%c0_312, %c0_313, %c2_314, %c5_315, %c0_316], %252 {strides = array<i32>} : memref<1x4x4x8x8xf32, #tpu.memory_space<vmem>>, vector<1x4x1x1x8xf32>,
    %253 = vector.extract_strided_slice %228 {offsets = [0, 54], sizes = [4, 8], strides = [1, 1]} : vector<4x72xf32> to vector<4x8xf32>
    %c0_317 = arith.constant 0 : index
    %c0_318 = arith.constant 0 : index
    %c2_319 = arith.constant 2 : index
    %c6_320 = arith.constant 6 : index
    %c0_321 = arith.constant 0 : index
    %254 = vector.load %arg3[%c0_317, %c0_318, %c2_319, %c6_320, %c0_321] : memref<1x4x4x8x8xf32, #tpu.memory_space<vmem>>, vector<1x4x1x1x8xf32>
    %255 = vector.shape_cast %254 : vector<1x4x1x1x8xf32> to vector<4x8xf32>
    %256 = vector.shape_cast %253 : vector<4x8xf32> to vector<1x4x1x1x8xf32>
    tpu.vector_store %arg3[%c0_317, %c0_318, %c2_319, %c6_320, %c0_321], %256 {strides = array<i32>} : memref<1x4x4x8x8xf32, #tpu.memory_space<vmem>>, vector<1x4x1x1x8xf32>,
    %257 = vector.extract_strided_slice %228 {offsets = [0, 63], sizes = [4, 8], strides = [1, 1]} : vector<4x72xf32> to vector<4x8xf32>
    %c0_322 = arith.constant 0 : index
    %c0_323 = arith.constant 0 : index
    %c2_324 = arith.constant 2 : index
    %c7_325 = arith.constant 7 : index
    %c0_326 = arith.constant 0 : index
    %258 = vector.load %arg3[%c0_322, %c0_323, %c2_324, %c7_325, %c0_326] : memref<1x4x4x8x8xf32, #tpu.memory_space<vmem>>, vector<1x4x1x1x8xf32>
    %259 = vector.shape_cast %258 : vector<1x4x1x1x8xf32> to vector<4x8xf32>
    %260 = vector.shape_cast %257 : vector<4x8xf32> to vector<1x4x1x1x8xf32>
    tpu.vector_store %arg3[%c0_322, %c0_323, %c2_324, %c7_325, %c0_326], %260 {strides = array<i32>} : memref<1x4x4x8x8xf32, #tpu.memory_space<vmem>>, vector<1x4x1x1x8xf32>,
    %cst_327 = arith.constant 0.000000e+00 : f32
    %261 = vector.broadcast %cst_327 : f32 to vector<4x72xf32>
    %c0_328 = arith.constant 0 : index
    %c3_329 = arith.constant 3 : index
    %c0_330 = arith.constant 0 : index
    %c0_331 = arith.constant 0 : index
    %262 = vector.load %arg2[%c0_328, %c3_329, %c0_330, %c0_331] : memref<1x4x8x90xbf16, #tpu.memory_space<vmem>>, vector<1x1x8x72xbf16>
    %263 = vector.shape_cast %262 : vector<1x1x8x72xbf16> to vector<8x72xbf16>
    %c0_332 = arith.constant 0 : index
    %c0_333 = arith.constant 0 : index
    %c0_334 = arith.constant 0 : index
    %264 = vector.load %arg1[%c0_332, %c0_333, %c0_334] : memref<9x4x8xbf16, #tpu.memory_space<vmem>>, vector<1x4x8xbf16>
    %265 = vector.shape_cast %264 : vector<1x4x8xbf16> to vector<4x8xbf16>
    %cst_335 = arith.constant dense<0.000000e+00> : vector<4x72xf32>
    %266 = tpu.matmul %265, %263, %cst_335 {dimension_numbers = #tpu.dot_dimension_numbers<[1], [0], [0], [1], [0, 0, 1, 1], [], []>} : vector<4x8xbf16>, vector<8x72xbf16>, vector<4x72xf32> -> vector<4x72xf32>
    %267 = arith.addf %261, %266 : vector<4x72xf32>
    %c0_336 = arith.constant 0 : index
    %c2_337 = arith.constant 2 : index
    %c0_338 = arith.constant 0 : index
    %c1_339 = arith.constant 1 : index
    %268 = vector.load %arg2[%c0_336, %c2_337, %c0_338, %c1_339] : memref<1x4x8x90xbf16, #tpu.memory_space<vmem>>, vector<1x1x8x72xbf16>
    %269 = vector.shape_cast %268 : vector<1x1x8x72xbf16> to vector<8x72xbf16>
    %c1_340 = arith.constant 1 : index
    %c0_341 = arith.constant 0 : index
    %c0_342 = arith.constant 0 : index
    %270 = vector.load %arg1[%c1_340, %c0_341, %c0_342] : memref<9x4x8xbf16, #tpu.memory_space<vmem>>, vector<1x4x8xbf16>
    %271 = vector.shape_cast %270 : vector<1x4x8xbf16> to vector<4x8xbf16>
    %cst_343 = arith.constant dense<0.000000e+00> : vector<4x72xf32>
    %272 = tpu.matmul %271, %269, %cst_343 {dimension_numbers = #tpu.dot_dimension_numbers<[1], [0], [0], [1], [0, 0, 1, 1], [], []>} : vector<4x8xbf16>, vector<8x72xbf16>, vector<4x72xf32> -> vector<4x72xf32>
    %273 = arith.addf %267, %272 : vector<4x72xf32>
    %c0_344 = arith.constant 0 : index
    %c3_345 = arith.constant 3 : index
    %c0_346 = arith.constant 0 : index
    %c1_347 = arith.constant 1 : index
    %274 = vector.load %arg2[%c0_344, %c3_345, %c0_346, %c1_347] : memref<1x4x8x90xbf16, #tpu.memory_space<vmem>>, vector<1x1x8x72xbf16>
    %275 = vector.shape_cast %274 : vector<1x1x8x72xbf16> to vector<8x72xbf16>
    %c2_348 = arith.constant 2 : index
    %c0_349 = arith.constant 0 : index
    %c0_350 = arith.constant 0 : index
    %276 = vector.load %arg1[%c2_348, %c0_349, %c0_350] : memref<9x4x8xbf16, #tpu.memory_space<vmem>>, vector<1x4x8xbf16>
    %277 = vector.shape_cast %276 : vector<1x4x8xbf16> to vector<4x8xbf16>
    %cst_351 = arith.constant dense<0.000000e+00> : vector<4x72xf32>
    %278 = tpu.matmul %277, %275, %cst_351 {dimension_numbers = #tpu.dot_dimension_numbers<[1], [0], [0], [1], [0, 0, 1, 1], [], []>} : vector<4x8xbf16>, vector<8x72xbf16>, vector<4x72xf32> -> vector<4x72xf32>
    %279 = arith.addf %273, %278 : vector<4x72xf32>
    %c0_352 = arith.constant 0 : index
    %c1_353 = arith.constant 1 : index
    %c0_354 = arith.constant 0 : index
    %c9_355 = arith.constant 9 : index
    %280 = vector.load %arg2[%c0_352, %c1_353, %c0_354, %c9_355] : memref<1x4x8x90xbf16, #tpu.memory_space<vmem>>, vector<1x1x8x72xbf16>
    %281 = vector.shape_cast %280 : vector<1x1x8x72xbf16> to vector<8x72xbf16>
    %c3_356 = arith.constant 3 : index
    %c0_357 = arith.constant 0 : index
    %c0_358 = arith.constant 0 : index
    %282 = vector.load %arg1[%c3_356, %c0_357, %c0_358] : memref<9x4x8xbf16, #tpu.memory_space<vmem>>, vector<1x4x8xbf16>
    %283 = vector.shape_cast %282 : vector<1x4x8xbf16> to vector<4x8xbf16>
    %cst_359 = arith.constant dense<0.000000e+00> : vector<4x72xf32>
    %284 = tpu.matmul %283, %281, %cst_359 {dimension_numbers = #tpu.dot_dimension_numbers<[1], [0], [0], [1], [0, 0, 1, 1], [], []>} : vector<4x8xbf16>, vector<8x72xbf16>, vector<4x72xf32> -> vector<4x72xf32>
    %285 = arith.addf %279, %284 : vector<4x72xf32>
    %c0_360 = arith.constant 0 : index
    %c0_361 = arith.constant 0 : index
    %c0_362 = arith.constant 0 : index
    %c10_363 = arith.constant 10 : index
    %286 = vector.load %arg2[%c0_360, %c0_361, %c0_362, %c10_363] : memref<1x4x8x90xbf16, #tpu.memory_space<vmem>>, vector<1x1x8x72xbf16>
    %287 = vector.shape_cast %286 : vector<1x1x8x72xbf16> to vector<8x72xbf16>
    %c4_364 = arith.constant 4 : index
    %c0_365 = arith.constant 0 : index
    %c0_366 = arith.constant 0 : index
    %288 = vector.load %arg1[%c4_364, %c0_365, %c0_366] : memref<9x4x8xbf16, #tpu.memory_space<vmem>>, vector<1x4x8xbf16>
    %289 = vector.shape_cast %288 : vector<1x4x8xbf16> to vector<4x8xbf16>
    %cst_367 = arith.constant dense<0.000000e+00> : vector<4x72xf32>
    %290 = tpu.matmul %289, %287, %cst_367 {dimension_numbers = #tpu.dot_dimension_numbers<[1], [0], [0], [1], [0, 0, 1, 1], [], []>} : vector<4x8xbf16>, vector<8x72xbf16>, vector<4x72xf32> -> vector<4x72xf32>
    %291 = arith.addf %285, %290 : vector<4x72xf32>
    %c0_368 = arith.constant 0 : index
    %c1_369 = arith.constant 1 : index
    %c0_370 = arith.constant 0 : index
    %c10_371 = arith.constant 10 : index
    %292 = vector.load %arg2[%c0_368, %c1_369, %c0_370, %c10_371] : memref<1x4x8x90xbf16, #tpu.memory_space<vmem>>, vector<1x1x8x72xbf16>
    %293 = vector.shape_cast %292 : vector<1x1x8x72xbf16> to vector<8x72xbf16>
    %c5_372 = arith.constant 5 : index
    %c0_373 = arith.constant 0 : index
    %c0_374 = arith.constant 0 : index
    %294 = vector.load %arg1[%c5_372, %c0_373, %c0_374] : memref<9x4x8xbf16, #tpu.memory_space<vmem>>, vector<1x4x8xbf16>
    %295 = vector.shape_cast %294 : vector<1x4x8xbf16> to vector<4x8xbf16>
    %cst_375 = arith.constant dense<0.000000e+00> : vector<4x72xf32>
    %296 = tpu.matmul %295, %293, %cst_375 {dimension_numbers = #tpu.dot_dimension_numbers<[1], [0], [0], [1], [0, 0, 1, 1], [], []>} : vector<4x8xbf16>, vector<8x72xbf16>, vector<4x72xf32> -> vector<4x72xf32>
    %297 = arith.addf %291, %296 : vector<4x72xf32>
    %c0_376 = arith.constant 0 : index
    %c3_377 = arith.constant 3 : index
    %c0_378 = arith.constant 0 : index
    %c9_379 = arith.constant 9 : index
    %298 = vector.load %arg2[%c0_376, %c3_377, %c0_378, %c9_379] : memref<1x4x8x90xbf16, #tpu.memory_space<vmem>>, vector<1x1x8x72xbf16>
    %299 = vector.shape_cast %298 : vector<1x1x8x72xbf16> to vector<8x72xbf16>
    %c6_380 = arith.constant 6 : index
    %c0_381 = arith.constant 0 : index
    %c0_382 = arith.constant 0 : index
    %300 = vector.load %arg1[%c6_380, %c0_381, %c0_382] : memref<9x4x8xbf16, #tpu.memory_space<vmem>>, vector<1x4x8xbf16>
    %301 = vector.shape_cast %300 : vector<1x4x8xbf16> to vector<4x8xbf16>
    %cst_383 = arith.constant dense<0.000000e+00> : vector<4x72xf32>
    %302 = tpu.matmul %301, %299, %cst_383 {dimension_numbers = #tpu.dot_dimension_numbers<[1], [0], [0], [1], [0, 0, 1, 1], [], []>} : vector<4x8xbf16>, vector<8x72xbf16>, vector<4x72xf32> -> vector<4x72xf32>
    %303 = arith.addf %297, %302 : vector<4x72xf32>
    %c0_384 = arith.constant 0 : index
    %c2_385 = arith.constant 2 : index
    %c0_386 = arith.constant 0 : index
    %c10_387 = arith.constant 10 : index
    %304 = vector.load %arg2[%c0_384, %c2_385, %c0_386, %c10_387] : memref<1x4x8x90xbf16, #tpu.memory_space<vmem>>, vector<1x1x8x72xbf16>
    %305 = vector.shape_cast %304 : vector<1x1x8x72xbf16> to vector<8x72xbf16>
    %c7_388 = arith.constant 7 : index
    %c0_389 = arith.constant 0 : index
    %c0_390 = arith.constant 0 : index
    %306 = vector.load %arg1[%c7_388, %c0_389, %c0_390] : memref<9x4x8xbf16, #tpu.memory_space<vmem>>, vector<1x4x8xbf16>
    %307 = vector.shape_cast %306 : vector<1x4x8xbf16> to vector<4x8xbf16>
    %cst_391 = arith.constant dense<0.000000e+00> : vector<4x72xf32>
    %308 = tpu.matmul %307, %305, %cst_391 {dimension_numbers = #tpu.dot_dimension_numbers<[1], [0], [0], [1], [0, 0, 1, 1], [], []>} : vector<4x8xbf16>, vector<8x72xbf16>, vector<4x72xf32> -> vector<4x72xf32>
    %309 = arith.addf %303, %308 : vector<4x72xf32>
    %c0_392 = arith.constant 0 : index
    %c3_393 = arith.constant 3 : index
    %c0_394 = arith.constant 0 : index
    %c10_395 = arith.constant 10 : index
    %310 = vector.load %arg2[%c0_392, %c3_393, %c0_394, %c10_395] : memref<1x4x8x90xbf16, #tpu.memory_space<vmem>>, vector<1x1x8x72xbf16>
    %311 = vector.shape_cast %310 : vector<1x1x8x72xbf16> to vector<8x72xbf16>
    %c8_396 = arith.constant 8 : index
    %c0_397 = arith.constant 0 : index
    %c0_398 = arith.constant 0 : index
    %312 = vector.load %arg1[%c8_396, %c0_397, %c0_398] : memref<9x4x8xbf16, #tpu.memory_space<vmem>>, vector<1x4x8xbf16>
    %313 = vector.shape_cast %312 : vector<1x4x8xbf16> to vector<4x8xbf16>
    %cst_399 = arith.constant dense<0.000000e+00> : vector<4x72xf32>
    %314 = tpu.matmul %313, %311, %cst_399 {dimension_numbers = #tpu.dot_dimension_numbers<[1], [0], [0], [1], [0, 0, 1, 1], [], []>} : vector<4x8xbf16>, vector<8x72xbf16>, vector<4x72xf32> -> vector<4x72xf32>
    %315 = arith.addf %309, %314 : vector<4x72xf32>
    %316 = vector.extract_strided_slice %315 {offsets = [0, 0], sizes = [4, 8], strides = [1, 1]} : vector<4x72xf32> to vector<4x8xf32>
    %c0_400 = arith.constant 0 : index
    %c0_401 = arith.constant 0 : index
    %c3_402 = arith.constant 3 : index
    %c0_403 = arith.constant 0 : index
    %c0_404 = arith.constant 0 : index
    %317 = vector.load %arg3[%c0_400, %c0_401, %c3_402, %c0_403, %c0_404] : memref<1x4x4x8x8xf32, #tpu.memory_space<vmem>>, vector<1x4x1x1x8xf32>
    %318 = vector.shape_cast %317 : vector<1x4x1x1x8xf32> to vector<4x8xf32>
    %319 = vector.shape_cast %316 : vector<4x8xf32> to vector<1x4x1x1x8xf32>
    tpu.vector_store %arg3[%c0_400, %c0_401, %c3_402, %c0_403, %c0_404], %319 {strides = array<i32>} : memref<1x4x4x8x8xf32, #tpu.memory_space<vmem>>, vector<1x4x1x1x8xf32>,
    %320 = vector.extract_strided_slice %315 {offsets = [0, 9], sizes = [4, 8], strides = [1, 1]} : vector<4x72xf32> to vector<4x8xf32>
    %c0_405 = arith.constant 0 : index
    %c0_406 = arith.constant 0 : index
    %c3_407 = arith.constant 3 : index
    %c1_408 = arith.constant 1 : index
    %c0_409 = arith.constant 0 : index
    %321 = vector.load %arg3[%c0_405, %c0_406, %c3_407, %c1_408, %c0_409] : memref<1x4x4x8x8xf32, #tpu.memory_space<vmem>>, vector<1x4x1x1x8xf32>
    %322 = vector.shape_cast %321 : vector<1x4x1x1x8xf32> to vector<4x8xf32>
    %323 = vector.shape_cast %320 : vector<4x8xf32> to vector<1x4x1x1x8xf32>
    tpu.vector_store %arg3[%c0_405, %c0_406, %c3_407, %c1_408, %c0_409], %323 {strides = array<i32>} : memref<1x4x4x8x8xf32, #tpu.memory_space<vmem>>, vector<1x4x1x1x8xf32>,
    %324 = vector.extract_strided_slice %315 {offsets = [0, 18], sizes = [4, 8], strides = [1, 1]} : vector<4x72xf32> to vector<4x8xf32>
    %c0_410 = arith.constant 0 : index
    %c0_411 = arith.constant 0 : index
    %c3_412 = arith.constant 3 : index
    %c2_413 = arith.constant 2 : index
    %c0_414 = arith.constant 0 : index
    %325 = vector.load %arg3[%c0_410, %c0_411, %c3_412, %c2_413, %c0_414] : memref<1x4x4x8x8xf32, #tpu.memory_space<vmem>>, vector<1x4x1x1x8xf32>
    %326 = vector.shape_cast %325 : vector<1x4x1x1x8xf32> to vector<4x8xf32>
    %327 = vector.shape_cast %324 : vector<4x8xf32> to vector<1x4x1x1x8xf32>
    tpu.vector_store %arg3[%c0_410, %c0_411, %c3_412, %c2_413, %c0_414], %327 {strides = array<i32>} : memref<1x4x4x8x8xf32, #tpu.memory_space<vmem>>, vector<1x4x1x1x8xf32>,
    %328 = vector.extract_strided_slice %315 {offsets = [0, 27], sizes = [4, 8], strides = [1, 1]} : vector<4x72xf32> to vector<4x8xf32>
    %c0_415 = arith.constant 0 : index
    %c0_416 = arith.constant 0 : index
    %c3_417 = arith.constant 3 : index
    %c3_418 = arith.constant 3 : index
    %c0_419 = arith.constant 0 : index
    %329 = vector.load %arg3[%c0_415, %c0_416, %c3_417, %c3_418, %c0_419] : memref<1x4x4x8x8xf32, #tpu.memory_space<vmem>>, vector<1x4x1x1x8xf32>
    %330 = vector.shape_cast %329 : vector<1x4x1x1x8xf32> to vector<4x8xf32>
    %331 = vector.shape_cast %328 : vector<4x8xf32> to vector<1x4x1x1x8xf32>
    tpu.vector_store %arg3[%c0_415, %c0_416, %c3_417, %c3_418, %c0_419], %331 {strides = array<i32>} : memref<1x4x4x8x8xf32, #tpu.memory_space<vmem>>, vector<1x4x1x1x8xf32>,
    %332 = vector.extract_strided_slice %315 {offsets = [0, 36], sizes = [4, 8], strides = [1, 1]} : vector<4x72xf32> to vector<4x8xf32>
    %c0_420 = arith.constant 0 : index
    %c0_421 = arith.constant 0 : index
    %c3_422 = arith.constant 3 : index
    %c4_423 = arith.constant 4 : index
    %c0_424 = arith.constant 0 : index
    %333 = vector.load %arg3[%c0_420, %c0_421, %c3_422, %c4_423, %c0_424] : memref<1x4x4x8x8xf32, #tpu.memory_space<vmem>>, vector<1x4x1x1x8xf32>
    %334 = vector.shape_cast %333 : vector<1x4x1x1x8xf32> to vector<4x8xf32>
    %335 = vector.shape_cast %332 : vector<4x8xf32> to vector<1x4x1x1x8xf32>
    tpu.vector_store %arg3[%c0_420, %c0_421, %c3_422, %c4_423, %c0_424], %335 {strides = array<i32>} : memref<1x4x4x8x8xf32, #tpu.memory_space<vmem>>, vector<1x4x1x1x8xf32>,
    %336 = vector.extract_strided_slice %315 {offsets = [0, 45], sizes = [4, 8], strides = [1, 1]} : vector<4x72xf32> to vector<4x8xf32>
    %c0_425 = arith.constant 0 : index
    %c0_426 = arith.constant 0 : index
    %c3_427 = arith.constant 3 : index
    %c5_428 = arith.constant 5 : index
    %c0_429 = arith.constant 0 : index
    %337 = vector.load %arg3[%c0_425, %c0_426, %c3_427, %c5_428, %c0_429] : memref<1x4x4x8x8xf32, #tpu.memory_space<vmem>>, vector<1x4x1x1x8xf32>
    %338 = vector.shape_cast %337 : vector<1x4x1x1x8xf32> to vector<4x8xf32>
    %339 = vector.shape_cast %336 : vector<4x8xf32> to vector<1x4x1x1x8xf32>
    tpu.vector_store %arg3[%c0_425, %c0_426, %c3_427, %c5_428, %c0_429], %339 {strides = array<i32>} : memref<1x4x4x8x8xf32, #tpu.memory_space<vmem>>, vector<1x4x1x1x8xf32>,
    %340 = vector.extract_strided_slice %315 {offsets = [0, 54], sizes = [4, 8], strides = [1, 1]} : vector<4x72xf32> to vector<4x8xf32>
    %c0_430 = arith.constant 0 : index
    %c0_431 = arith.constant 0 : index
    %c3_432 = arith.constant 3 : index
    %c6_433 = arith.constant 6 : index
    %c0_434 = arith.constant 0 : index
    %341 = vector.load %arg3[%c0_430, %c0_431, %c3_432, %c6_433, %c0_434] : memref<1x4x4x8x8xf32, #tpu.memory_space<vmem>>, vector<1x4x1x1x8xf32>
    %342 = vector.shape_cast %341 : vector<1x4x1x1x8xf32> to vector<4x8xf32>
    %343 = vector.shape_cast %340 : vector<4x8xf32> to vector<1x4x1x1x8xf32>
    tpu.vector_store %arg3[%c0_430, %c0_431, %c3_432, %c6_433, %c0_434], %343 {strides = array<i32>} : memref<1x4x4x8x8xf32, #tpu.memory_space<vmem>>, vector<1x4x1x1x8xf32>,
    %344 = vector.extract_strided_slice %315 {offsets = [0, 63], sizes = [4, 8], strides = [1, 1]} : vector<4x72xf32> to vector<4x8xf32>
    %c0_435 = arith.constant 0 : index
    %c0_436 = arith.constant 0 : index
    %c3_437 = arith.constant 3 : index
    %c7_438 = arith.constant 7 : index
    %c0_439 = arith.constant 0 : index
    %345 = vector.load %arg3[%c0_435, %c0_436, %c3_437, %c7_438, %c0_439] : memref<1x4x4x8x8xf32, #tpu.memory_space<vmem>>, vector<1x4x1x1x8xf32>
    %346 = vector.shape_cast %345 : vector<1x4x1x1x8xf32> to vector<4x8xf32>
    %347 = vector.shape_cast %344 : vector<4x8xf32> to vector<1x4x1x1x8xf32>
    tpu.vector_store %arg3[%c0_435, %c0_436, %c3_437, %c7_438, %c0_439], %347 {strides = array<i32>} : memref<1x4x4x8x8xf32, #tpu.memory_space<vmem>>, vector<1x4x1x1x8xf32>,
    return
  }
  func.func @transform_0(%arg0: i32) -> (i32, i32, i32) {
    %c0_i32 = arith.constant 0 : i32
    %c0_i32_0 = arith.constant 0 : i32
    %c0_i32_1 = arith.constant 0 : i32
    %c0_i32_2 = arith.constant 0 : i32
    return %c0_i32, %c0_i32_0, %c0_i32_1 : i32, i32, i32
  }
  func.func @transform_1(%arg0: i32) -> (i32, i32, i32, i32) {
    %c0_i32 = arith.constant 0 : i32
    %c0_i32_0 = arith.constant 0 : i32
    %c0_i32_1 = arith.constant 0 : i32
    %c0_i32_2 = arith.constant 0 : i32
    return %arg0, %c0_i32, %c0_i32_0, %c0_i32_1 : i32, i32, i32, i32
  }
  func.func @transform_2(%arg0: i32) -> (i32, i32, i32, i32, i32) {
    %c0_i32 = arith.constant 0 : i32
    %c0_i32_0 = arith.constant 0 : i32
    %c0_i32_1 = arith.constant 0 : i32
    %c0_i32_2 = arith.constant 0 : i32
    %c0_i32_3 = arith.constant 0 : i32
    return %arg0, %c0_i32, %c0_i32_0, %c0_i32_1, %c0_i32_2 : i32, i32, i32, i32, i32
  }
}

</mosaic_0001>

<bundles_post_ra>
// kernel: downsample_forward.1
= control target key start
LH: loop header
LB: loop body
LE: loop exit
PB: predicated region body
PF: predicated region fallthrough
CT: control target
= control target key end

     0   :  { %7 = vsyncpa [#allocation3], 0  ;;  %s4501_s0 = inlined_call_operand.hbm [shape: bf16[9,4,8], index: 0, kind: input, shape index: {}]   ;;  %s4502_s1 = inlined_call_operand.hbm [shape: bf16[2,4,8,90], index: 1, kind: input, shape index: {}]   ;;  %s4503_s2 = inlined_call_operand.hbm [shape: f32[2,4,4,8,8], index: 2, kind: output, shape index: {}]  }
   0x1   :  { %8 = vsyncpa [#allocation6], 0 }
   0x2   :  { %10 = vsyncpa [#allocation6 + $0x1], 0 }
   0x3   :  { %11 = vsyncpa [#allocation4], 0 }
   0x4   :  { %13 = vsyncpa [#allocation4 + $0x1], 0  ;;  %s3622_s9 = smov 0   ;;  %s3624_s10 = smov 0  }
   0x5   :  { %s3626_s11 = smov 0   ;;  %s3628_s12 = smov 0  }
   0x6 LB: > { %s3643_s13 = sadd.s32 4294967295, %s3584_s12   ;;  %s2773_s14 = sadd.s32 4294967294, %s3584_s12   ;;  %s3584_s12 = sphi %s3628_s12, %s4523_s12   ;;  %s3580_s11 = sphi %s3626_s11, %s4522_s11   ;;  %s3576_s10 = sphi %s3624_s10, %s4521_s10   ;;  %s3572_s9 = sphi %s3622_s9, %s4520_s9  }
   0x7   : > { %p60_p0 = scmp.ne.s32.totalorder %s3576_s10, %s3572_s9  ;;  %p4504_p1 = scmp.eq.s32.totalorder %s3643_s13, 0 }
   0x8   : > { %p90_p3 = scmp.eq.s32.totalorder %s2773_s14, 1  ;;  %p2774_p5 = scmp.ge.s32.totalorder %s3584_s12, 1 }
   0x9   : > { %p3652_p4 = por %p4504_p1, %p60_p0  ;;  %p97_p7 = scmp.lt.s32.totalorder %s3584_s12, 3 }
   0xa   : > { %p3657_p6 = por %p90_p3, %p60_p0  ;;  %s3586_s18 = smov [#allocation2]  }
   0xb   : > { %s4507_s15 = scalar_select %p3652_p4, 1, 0 }
   0xc   : > { %s4508_s16 = scalar_select %p3657_p6, 1, 0 }
   0xd   : > { %p3662_p8 = pnand %p2774_p5, %p97_p7  ;;  %s109_s19 = sshll.u32 %s3586_s18, 4  ;;  %s3666_s19 = int_to_ptr.vmem [resolvable:$true] %s109_s19 }
   0xe   : > { %s3678_s21 = sadd.s32 1, %s3584_s12   ;;  %s47_s22 = sadd.s32 1, %s3580_s11 }
   0xf   : > { %s4509_s17 = scalar_select %p3662_p8, 1, 0 }
  0x10   : > { %p3374_p9 = pneg %p3662_p8  ;;  %s44_s23 = ssub.s32 %s3584_s12, %s3678_s21 }
  0x11   : > { %s3456_s26 = scalar_lea.hbm %s4501_s0, 288 }
  0x12   : > { %p3673_p11 = pnand %p3374_p9, %p4504_p1  ;;  %p3457_p12 = scmp.ne.s32.totalorder %s4501_s0, %s3456_s26 }
  0x13   : > { %p3463_p5 = scmp.lt.u32.totalorder %s3456_s26, %s4501_s0 }
  0x14   : > { %p3458_p13 = pneg %p3673_p11 }
  0x16   : > { %p3459_p0 = pnand %p3458_p13, %p3457_p12 }
  0x18   : > { %p3460_p3 = pneg %p3459_p0 }
  0x1a   : > { %p3465_p7 = pnand %p3463_p5, %p3460_p3 }
  0x1c   : > { %3468 = shalt.err (!%p3465_p7)
}
  0x1d   : > { %s3469_s3 = scalar_lea.vmem %s3666_s19, 288  ;;  %p3477_p2 = scmp.lt.s32.totalorder %s3666_s19, %s3666_s19 }
  0x1e   : > { %p3470_p9 = scmp.ne.s32.totalorder %s3666_s19, %s3469_s3  ;;  %p3478_p6 = scmp.lt.s32.totalorder %s3469_s3, %s3469_s3 }
  0x20   : > { %p3472_p10 = pnand %p3470_p9, %p3458_p13  ;;  %p3479_p4 = por %p3478_p6, %p3477_p2 }
  0x22   : > { %p3473_p1 = pneg %p3472_p10 }
  0x24   : > { %p3480_p8 = pnand %p3479_p4, %p3473_p1 }
  0x26   : > { %3483 = shalt.err (!%p3480_p8)
}
  0x27   : > { %s3587_s4 = smov 32   ;;  %s3588_s5 = smov 2  }
  0x28   : > { %3377 = dma.hbm_to_vmem [thread:$0]  (!%p3673_p11), %s4501_s0, 288, %s3666_s19, [#allocation3], %s3587_s4, %s3587_s4, %s3588_s5  }
  0x29   : > { %p45_p2 = scmp.eq.s32.totalorder %s44_s23, 0  ;;  %p54_p1 = scmp.ne.s32.totalorder %s3580_s11, %s3576_s10 }
  0x2a   : > { %p55_p4 = scmp.eq.s32.totalorder %s3584_s12, 0  ;;  %p3387_p6 = scmp.lt.s32.totalorder %s3584_s12, 2 }
  0x2b   : > { %s3709_s8 = scalar_select %p45_p2, %s3580_s11, %s47_s22  }
  0x2c   : > { %p56_p8 = por %p55_p4, %p54_p1  ;;  %p4511_p10 = scmp.eq.s32.totalorder %s3643_s13, 1 }
  0x2d   : > { %s123_s18 = sand.u32 1, %s3580_s11   ;;  %s2948_s24 = sshll.u32 %s3584_s12, 8 }
  0x2e   : > { %p3713_p12 = por %p4511_p10, %p54_p1  ;;  %s2777_s25 = sshll.u32 %s123_s18, 4 }
  0x2f   : > { %s3722_s27 = scalar_lea.hbm %s4502_s1, %s2948_s24  ;;  %s127_s19 = scalar_lea.vmem [#allocation5], %s2777_s25 }
  0x30   : > { %s134_s22 = sshll.u32 %s127_s19, 4  ;;  %p3724_p11 = pnand %p3387_p6, %p56_p8  ;;  %s3728_s22 = int_to_ptr.vmem [resolvable:$true] %s134_s22 }
  0x31   : > { %s3730_s28 = scalar_lea.sflag [#allocation6], %s123_s18  ;;  %s3484_s29 = scalar_lea.hbm %s3722_s27, 256 }
  0x32   : > { %p3485_p13 = scmp.ne.s32.totalorder %s3722_s27, %s3484_s29  ;;  %p3486_p0 = pneg %p3724_p11 }
  0x33   : > { %s3489_s4 = scalar_lea.hbm %s4502_s1, 512  ;;  %p3490_p7 = scmp.lt.u32.totalorder %s3722_s27, %s4502_s1 }
  0x34   : > { %p3487_p3 = pnand %p3486_p0, %p3485_p13  ;;  %p3491_p9 = scmp.lt.u32.totalorder %s3489_s4, %s3484_s29 }
  0x35   : > { %p3493_p1 = scmp.lt.u32.totalorder %s3484_s29, %s3722_s27 }
  0x36   : > { %p3488_p5 = pneg %p3487_p3  ;;  %p3492_p2 = por %p3491_p9, %p3490_p7 }
  0x38   : > { %p3494_p4 = por %p3493_p1, %p3492_p2 }
  0x3a   : > { %p3495_p6 = pnand %p3494_p4, %p3488_p5 }
  0x3c   : > { %3498 = shalt.err (!%p3495_p6)
}
  0x3d   : > { %s3499_s7 = scalar_lea.vmem %s3728_s22, 256  ;;  %s3589_s18 = smov [#allocation5]  }
  0x3e   : > { %p3500_p8 = scmp.ne.s32.totalorder %s3728_s22, %s3499_s7  ;;  %s3504_s24 = sshll.u32 %s3589_s18, 4  ;;  %s3505_s24 = int_to_ptr.vmem [resolvable:$false] %s3504_s24 }
  0x3f   : > { %s3506_s25 = scalar_lea.vmem %s3505_s24, 512  ;;  %p3507_p3 = scmp.lt.s32.totalorder %s3728_s22, %s3505_s24 }
  0x40   : > { %p3502_p10 = pnand %p3500_p8, %p3486_p0  ;;  %p3508_p7 = scmp.lt.s32.totalorder %s3506_s25, %s3499_s7 }
  0x42   : > { %p3503_p13 = pneg %p3502_p10  ;;  %p3509_p9 = por %p3508_p7, %p3507_p3 }
  0x44   : > { %p3510_p2 = pnand %p3509_p9, %p3503_p13 }
  0x46   : > { %3513 = shalt.err (!%p3510_p2)
}
  0x47   : > { %s3590_s20 = smov 64   ;;  %s3591_s26 = smov 4  }
  0x48   : > { %3381 = dma.hbm_to_vmem [thread:$0]  (!%p3724_p11), %s3722_s27, 256, %s3728_s22, %s3730_s28, %s3590_s20, %s3590_s20, %s3591_s26  }
  0x49   : > { %p4514_p0 = scmp.ne.s32.totalorder %s4509_s17, 0 }
  0x4a   : > { %p4515_p5 = scmp.eq.s32.totalorder (!%p4514_p0), %s3643_s13, 0 }
  0x4b   : > { %146 = sbr.rel (%p4514_p0) target bundleno = 855 (0x357), region = 28 }
  0x52   : > { %3559 = dma.done.wait (%p4515_p5), [#allocation3], 288   ;;  %p4516_p1 = pmov %p4515_p5 }
  0x53   : > { %s3765_s19 = sand.u32 1, %s3576_s10   ;;  %p4517_p11 = scmp.ne.s32.totalorder %s4507_s15, 0 }
  0x54   : > { %3561 = vsyncadd (%p4516_p1), [#allocation3], 4294967008  ;;  %s2782_s29 = sshll.u32 %s3765_s19, 4  ;;  %s153_s30 = scalar_lea.sflag [#allocation6], %s3765_s19 }
  0x55   : > { %s3769_s3 = scalar_lea.vmem [#allocation5], %s2782_s29 }
  0x56   : > { %3563 = dma.done.wait (%p4517_p11), %s153_s30, 256  }
  0x57   : > { %3565 = vsyncadd (%p4517_p11), %s153_s30, 4294967040  ;;  %v3592_v0 = vmov 0.0   ;;  %vm3593_vm0 = vmmov 0   ;;  %vm188_vm1 = vcmask 1043456   ;;  %v3441_v1 = vld [vmem:[%s3769_s3] ss:$0 sps:$4 sm:$0xff]  }
  0x58   : > { %3022 = vmatprep.subr.bf16.mxu0 %v3592_v0  ;;  %3024 = vmatprep.mubr.msk.bf16.mxu0 %vm3593_vm0, %v3592_v0  ;;  %v178_v2 = vld [vmem:[%s3769_s3] sm:$0xf]  ;;  %v3784_v3 = vld [vmem:[%s3769_s3 + $0x4] sm:$0xf]  ;;  %s3594_s15 = smov 127   ;;  %vm184_vm2 = vcmask 64512  }
  0x59   : > { %3076 = vmatprep.subr.bf16.mxu1 %v3592_v0  ;;  %3078 = vmatprep.mubr.msk.bf16.mxu1 %vm3593_vm0, %v3592_v0  ;;  %v2787_v4 = vcombine.low %v178_v2, %v178_v2  ;;  %v2803_v5 = vcombine.low %v3784_v3, %v3784_v3  ;;  %v2784_v6 = vld [vmem:[%s3769_s3 + $0x4] sm:$0xf]  ;;  %v3791_v7 = vld [vmem:[%s3769_s3 + $0x8] sm:$0xf]  ;;  %v183_v10 = vld [vmem:[#allocation2 + $0x2] sm:$0x3] }
  0x5a   : > { %813 = vrot.lane.b32.xlu0 %v3441_v1, %s3594_s15  ;;  %v190_v8 = vsel %vm188_vm1, %v2784_v6, 0  ;;  %v3445_v9 = vld [vmem:[%s3769_s3 + $0x8] ss:$0 sps:$4 sm:$0xff]   ;;  %v3797_v11 = vld [vmem:[%s3769_s3 + $0xc] sm:$0xf]  ;;  %v236_v12 = vsel %vm188_vm1, %v178_v2, 0  ;;  %v2793_v13 = vcombine.low %v3791_v7, %v3791_v7  ;;  %v2796_v15 = vcombine.low %v2784_v6, %v2784_v6 }
  0x5b   : > { %911 = vrot.lane.b32.xlu1 %v2803_v5, %s3594_s15  ;;  %3023 = vmatpush3.bf16.msra.mxu0 %v190_v8  ;;  %v2810_v14 = vcombine.low %v3797_v11, %v3797_v11  ;;  %s3595_s17 = smov 119   ;;  %v179_v16 = vld [vmem:[#allocation2] sm:$0x3]  ;;  %s3596_s27 = smov 118   ;;  %v3820_v17 = vld [vmem:[%s3769_s3 + $0x8] sm:$0xf] }
  0x5c   : > { %3028 = vmatprep.subr.bf16.mxu0 %v3592_v0  ;;  %v3448_v18 = vld [vmem:[%s3769_s3 + $0x8] ss:$0 sps:$4 sm:$0xff]   ;;  %v3824_v19 = vld [vmem:[%s3769_s3 + $0xc] sm:$0xf]  ;;  %v2851_v20 = vcombine.low %v3820_v17, %v3820_v17  ;;  %v3450_v22 = vld [vmem:[%s3769_s3] ss:$0 sps:$4 sm:$0xff]  }
  0x5d   : > { %v2900_v21 = vcombine.low %v3824_v19, %v3824_v19  ;;  %v3453_v23 = vld [vmem:[%s3769_s3 + $0x4] ss:$0 sps:$4 sm:$0xff]   ;;  %v3454_v25 = vld [vmem:[%s3769_s3] ss:$0 sps:$4 sm:$0xff]   ;;  %v3841_v26 = vld [vmem:[%s3769_s3 + $0xc] sm:$0xf] }
  0x5e   : > { %283 = vrot.lane.b32.xlu0 %v2787_v4, %s3594_s15  ;;  %3025 = vmatmul.mubr.msk.bf16.vlgmr.msra.gmra.mrb[0].mxu0 %vm184_vm2, %v183_v10  ;;  %v3452_v24 = vld [vmem:[%s3769_s3 + $0x4] ss:$0 sps:$4 sm:$0xff]   ;;  %v2860_v27 = vcombine.low %v3841_v26, %v3841_v26  ;;  %v809_v30 = vld [vmem:[#allocation2 + $0x2] sm:$0x3]  ;;  %v865_v31 = vsel %vm188_vm1, %v3784_v3, 0  ;;  %v340_v35 = vsel %vm188_vm1, %v3791_v7, 0 }
  0x5f   : > { %1014 = vrot.lane.b32.xlu1 %v3445_v9, %s3594_s15  ;;  %3029 = vmatpush3.bf16.msra.mxu0 %v236_v12  ;;  %v279_v34 = vld [vmem:[#allocation2 + $0x4] sm:$0x3]  ;;  %v807_v37 = vld [vmem:[#allocation2] sm:$0x3]  ;;  %v335_v40 = vld [vmem:[#allocation2 + $0x6] sm:$0x3] }
  0x60   : > { %3030 = vmatprep.mubr.msk.bf16.mxu0 %vm3593_vm0, %v3592_v0  ;;  %3034 = vmatprep.subr.bf16.mxu0 %v3592_v0  ;;  %v2791_v39 = vld [vmem:[%s3769_s3 + $0xc] sm:$0xf]  ;;  %v907_v42 = vld [vmem:[#allocation2 + $0x4] sm:$0x3]  ;;  %v966_v43 = vsel %vm188_vm1, %v3797_v11, 0  ;;  %v1436_v6 = vsel %vm188_vm1, %v3841_v26, 0 }
  0x61   : > { %v391_v41 = vsel %vm188_vm1, %v2791_v39, 0  ;;  %v386_v45 = vld [vmem:[#allocation2 + $0x8] sm:$0x3]  ;;  %v961_v48 = vld [vmem:[#allocation2 + $0x6] sm:$0x3]  ;;  %v1482_v11 = vsel %vm188_vm1, %v3820_v17, 0 }
  0x62   : > { %439 = vrot.lane.b32.xlu0 %v2793_v13, %s3594_s15  ;;  %v435_v51 = vld [vmem:[#allocation2 + $0xa] sm:$0x3]  ;;  %v1010_v54 = vld [vmem:[#allocation2 + $0x8] sm:$0x3]  ;;  %v489_v57 = vld [vmem:[#allocation2 + $0xc] sm:$0x3] }
  0x63   : > { %1067 = vrot.lane.b32.xlu1 %v2810_v14, %s3594_s15  ;;  %v1063_v60 = vld [vmem:[#allocation2 + $0xa] sm:$0x3]  ;;  %v540_v63 = vld [vmem:[#allocation2 + $0xe] sm:$0x3]  ;;  %v1116_v3 = vld [vmem:[#allocation2 + $0xc] sm:$0x3] }
  0x64   : > { %v1166_v8 = vld [vmem:[#allocation2 + $0xe] sm:$0x3]  ;;  %v1431_v9 = vld [vmem:[#allocation2 + $0x2] sm:$0x3]  ;;  %v1216_v14 = vld [vmem:[#allocation2 + $0x10] sm:$0x3] }
  0x65   : > { %v1685_v39 = vld [vmem:[#allocation2 + $0xa] sm:$0x3]  ;;  %s2783_s22 = sshll.u32 %s3765_s19, 7  ;;  %vm673_vm3 = vcmask 57344   ;;  %s3598_s28 = smov 110  }
  0x66   : > { %490 = vrot.lane.b32.xlu0 %v2787_v4, %s3595_s17  ;;  %s4027_s23 = scalar_lea.vmem [#allocation7], %s2783_s22  ;;  %s3599_s4 = smov 101  }
  0x67   : > { %1117 = vrot.lane.b32.xlu1 %v2803_v5, %s3595_s17  ;;  %s3600_s5 = smov 92   ;;  %s3601_s6 = smov 83  }
  0x68   : > { %s3602_s7 = smov 74   ;;  %s3603_s18 = smov 65  }
  0x69   : > { %s2949_s24 = sshll.u32 %s3643_s13, 11  ;;  %s2688_s25 = sshll.u32 %s4027_s23, 4  ;;  %s4453_s25 = int_to_ptr.vmem [resolvable:$true] %s2688_s25 }
  0x6a   : > { %544 = vrot.lane.b32.xlu0 %v2796_v15, %s3595_s17  ;;  %3031 = vmatmul.mubr.msk.bf16.vlgmr.msra.gmra.mrb[0].mxu0 %vm184_vm2, %v179_v16  ;;  %v1429_v15 = vld [vmem:[#allocation2] sm:$0x3]  ;;  %s4451_s29 = scalar_lea.hbm %s4503_s2, %s2949_s24  ;;  %s2675_s13 = scalar_lea.sflag [#allocation4], %s3765_s19 }
  0x6b   : > { %1167 = vrot.lane.b32.xlu1 %v3441_v1, %s3596_s27  ;;  %3036 = vmatprep.mubr.msk.bf16.mxu0 %vm3593_vm0, %v3592_v0  ;;  %s3514_s30 = scalar_lea.vmem %s4453_s25, 2048  ;;  %s3604_s3 = smov [#allocation7]  }
  0x6c   : > { %p3515_p4 = scmp.ne.s32.totalorder %s4453_s25, %s3514_s30 }
  0x6e   : > { %595 = vrot.lane.b32.xlu0 %v2787_v4, %s3596_s27  ;;  %p3516_p6 = pnand %p3515_p4, %p3713_p12 }
  0x6f   : > { %1217 = vrot.lane.b32.xlu1 %v2803_v5, %s3596_s27  ;;  %v594_v5 = vld [vmem:[#allocation2 + $0x10] sm:$0x3] }
  0x70   : > { %p3517_p8 = pneg %p3516_p6 }
  0x72   : > { %2057 = vrot.lane.b32.xlu0 %v3448_v18, %s3594_s15 }
  0x73   : > { %1528 = vrot.lane.b32.xlu1 %v2851_v20, %s3594_s15 }
  0x76   : > { %2155 = vrot.lane.b32.xlu0 %v2900_v21, %s3594_s15  ;;  %s3518_s15 = sshll.u32 %s3604_s3, 4  ;;  %s3519_s15 = int_to_ptr.vmem [resolvable:$false] %s3518_s15 }
  0x77   : > { %1582 = vrot.lane.b32.xlu1 %v3450_v22, %s3595_s17  ;;  %p3521_p10 = scmp.lt.s32.totalorder %s4453_s25, %s3519_s15 }
  0x7a   : > { %2209 = vrot.lane.b32.xlu0 %v3453_v23, %s3595_s17 }
  0x7b   : > { %1636 = vrot.lane.b32.xlu1 %v3452_v24, %s3595_s17  ;;  %v2051_v24 = vld [vmem:[#allocation2] sm:$0x3] }
  0x7e   : > { %2263 = vrot.lane.b32.xlu0 %v3454_v25, %s3596_s27 }
  0x7f   : > { %1686 = vrot.lane.b32.xlu1 %v3450_v22, %s3596_s27  ;;  %v1524_v22 = vld [vmem:[#allocation2 + $0x4] sm:$0x3] }
  0x82   : > { %2313 = vrot.lane.b32.xlu0 %v3453_v23, %s3596_s27 }
  0x83   : > { %1736 = vrot.lane.b32.xlu1 %v2851_v20, %s3595_s17 }
  0x86   : > { %2363 = vrot.lane.b32.xlu0 %v2900_v21, %s3595_s17 }
  0x87   : > { %1789 = vrot.lane.b32.xlu1 %v2860_v27, %s3595_s17  ;;  %v1578_v27 = vld [vmem:[#allocation2 + $0x6] sm:$0x3] }
  0x8a   : > { %2413 = vrot.lane.b32.xlu0 %v3448_v18, %s3596_s27  ;;  %v2053_v18 = vld [vmem:[#allocation2 + $0x2] sm:$0x3] }
  0x8b   : > { %1839 = vrot.lane.b32.xlu1 %v2851_v20, %s3596_s27  ;;  %v2109_v20 = vsel %vm188_vm1, %v3824_v19, 0 }
  0x8e   : > { %2463 = vrot.lane.b32.xlu0 %v2900_v21, %s3596_s27 }
  0xcc   : > { %v814_v28 = vpop.permute.xlu0 %813 }
  0xcd   : > { %v819_v29 = vsel %vm188_vm1, %v814_v28, 0  ;;  %v912_v36 = vpop.permute.xlu1 %911 }
  0xce   : > { %3077 = vmatpush3.bf16.msra.mxu1 %v819_v29  ;;  %v917_v38 = vsel %vm188_vm1, %v912_v36, 0  ;;  %v2205_v36 = vld [vmem:[#allocation2 + $0x6] sm:$0x3] }
  0xcf   : > { %3082 = vmatprep.subr.bf16.mxu1 %v3592_v0 }
  0xd0   : > { %v284_v32 = vpop.permute.xlu0 %283 }
  0xd1   : > { %v289_v33 = vsel %vm188_vm1, %v284_v32, 0  ;;  %3079 = vmatmul.mubr.msk.bf16.vlgmr.msra.gmra.mrb[0].mxu1 %vm184_vm2, %v809_v30  ;;  %v1015_v47 = vpop.permute.xlu1 %1014  ;;  %v2151_v30 = vld [vmem:[#allocation2 + $0x4] sm:$0x3] }
  0xd2   : > { %3035 = vmatpush3.bf16.msra.mxu0 %v289_v33  ;;  %3083 = vmatpush3.bf16.msra.mxu1 %v865_v31  ;;  %v1020_v49 = vsel %vm188_vm1, %v1015_v47, 0  ;;  %v1632_v33 = vld [vmem:[#allocation2 + $0x8] sm:$0x3] }
  0xd3   : > { %3084 = vmatprep.mubr.msk.bf16.mxu1 %vm3593_vm0, %v3592_v0  ;;  %3040 = vmatprep.subr.bf16.mxu0 %v3592_v0 }
  0xd4   : > { %3088 = vmatprep.subr.bf16.mxu1 %v3592_v0  ;;  %v440_v44 = vpop.permute.xlu0 %439 }
  0xd5   : > { %3037 = vmatmul.mubr.msk.bf16.vlgmr.msra.gmra.mrb[0].mxu0 %vm184_vm2, %v279_v34  ;;  %v445_v46 = vsel %vm188_vm1, %v440_v44, 0  ;;  %v1068_v53 = vpop.permute.xlu1 %1067 }
  0xd6   : > { %3041 = vmatpush3.bf16.msra.mxu0 %v340_v35  ;;  %3042 = vmatprep.mubr.msk.bf16.mxu0 %vm3593_vm0, %v3592_v0  ;;  %v1073_v55 = vsel %vm188_vm1, %v1068_v53, 0 }
  0xd7   : > { %3046 = vmatprep.subr.bf16.mxu0 %v3592_v0 }
  0xd8   : > { %v491_v50 = vpop.permute.xlu0 %490 }
  0xd9   : > { %v496_v52 = vsel %vm188_vm1, %v491_v50, 0  ;;  %v1118_v59 = vpop.permute.xlu1 %1117 }
  0xda   : > { %v1123_v61 = vsel %vm188_vm1, %v1118_v59, 0 }
  0xdc   : > { %v545_v56 = vpop.permute.xlu0 %544 }
  0xdd   : > { %3085 = vmatmul.mubr.msk.bf16.vlgmr.msra.gmra.mrb[0].mxu1 %vm184_vm2, %v807_v37  ;;  %v550_v58 = vsel %vm188_vm1, %v545_v56, 0  ;;  %v1168_v2 = vpop.permute.xlu1 %1167  ;;  %v1838_v56 = vld [vmem:[#allocation2 + $0x10] sm:$0x3] }
  0xde   : > { %3089 = vmatpush3.bf16.msra.mxu1 %v917_v38  ;;  %3090 = vmatprep.mubr.msk.bf16.mxu1 %vm3593_vm0, %v3592_v0  ;;  %v1173_v4 = vsel %vm188_vm1, %v1168_v2, 0 }
  0xdf   : > { %3094 = vmatprep.subr.bf16.mxu1 %v3592_v0 }
  0xe0   : > { %v596_v62 = vpop.permute.xlu0 %595 }
  0xe1   : > { %3043 = vmatmul.mubr.msk.bf16.vlgmr.msra.gmra.mrb[0].mxu0 %vm184_vm2, %v335_v40  ;;  %v601_v1 = vsel %vm188_vm1, %v596_v62, 0  ;;  %v1218_v7 = vpop.permute.xlu1 %1217 }
  0xe2   : > { %3047 = vmatpush3.bf16.msra.mxu0 %v391_v41  ;;  %3048 = vmatprep.mubr.msk.bf16.mxu0 %vm3593_vm0, %v3592_v0  ;;  %v1223_v10 = vsel %vm188_vm1, %v1218_v7, 0 }
  0xe3   : > { %3052 = vmatprep.subr.bf16.mxu0 %v3592_v0 }
  0xe4   : > { %v2058_v12 = vpop.permute.xlu0 %2057 }
  0xe5   : > { %v1529_v13 = vpop.permute.xlu1 %1528  ;;  %v2063_v16 = vsel %vm188_vm1, %v2058_v12, 0 }
  0xe6   : > { %v1534_v17 = vsel %vm188_vm1, %v1529_v13, 0 }
  0xe8   : > { %v2156_v19 = vpop.permute.xlu0 %2155 }
  0xe9   : > { %3091 = vmatmul.mubr.msk.bf16.vlgmr.msra.gmra.mrb[0].mxu1 %vm184_vm2, %v907_v42  ;;  %v1583_v21 = vpop.permute.xlu1 %1582  ;;  %v2161_v25 = vsel %vm188_vm1, %v2156_v19, 0  ;;  %v2259_v42 = vld [vmem:[#allocation2 + $0x8] sm:$0x3] }
  0xea   : > { %3095 = vmatpush3.bf16.msra.mxu1 %v966_v43  ;;  %3096 = vmatprep.mubr.msk.bf16.mxu1 %vm3593_vm0, %v3592_v0  ;;  %v1588_v23 = vsel %vm188_vm1, %v1583_v21, 0 }
  0xeb   : > { %3100 = vmatprep.subr.bf16.mxu1 %v3592_v0 }
  0xec   : > { %v2210_v29 = vpop.permute.xlu0 %2209 }
  0xed   : > { %3049 = vmatmul.mubr.msk.bf16.vlgmr.msra.gmra.mrb[0].mxu0 %vm184_vm2, %v386_v45  ;;  %v1637_v26 = vpop.permute.xlu1 %1636  ;;  %v2215_v31 = vsel %vm188_vm1, %v2210_v29, 0  ;;  %v1735_v45 = vld [vmem:[#allocation2 + $0xc] sm:$0x3] }
  0xee   : > { %3053 = vmatpush3.bf16.msra.mxu0 %v445_v46  ;;  %3054 = vmatprep.mubr.msk.bf16.mxu0 %vm3593_vm0, %v3592_v0  ;;  %v1642_v28 = vsel %vm188_vm1, %v1637_v26, 0 }
  0xef   : > { %3058 = vmatprep.subr.bf16.mxu0 %v3592_v0 }
  0xf0   : > { %v2264_v35 = vpop.permute.xlu0 %2263 }
  0xf1   : > { %v1687_v32 = vpop.permute.xlu1 %1686  ;;  %v2269_v37 = vsel %vm188_vm1, %v2264_v35, 0 }
  0xf2   : > { %v1692_v34 = vsel %vm188_vm1, %v1687_v32, 0 }
  0xf4   : > { %v2314_v41 = vpop.permute.xlu0 %2313 }
  0xf5   : > { %3097 = vmatmul.mubr.msk.bf16.vlgmr.msra.gmra.mrb[0].mxu1 %vm184_vm2, %v961_v48  ;;  %v1737_v38 = vpop.permute.xlu1 %1736  ;;  %v2319_v43 = vsel %vm188_vm1, %v2314_v41, 0  ;;  %v2312_v48 = vld [vmem:[#allocation2 + $0xa] sm:$0x3] }
  0xf6   : > { %3101 = vmatpush3.bf16.msra.mxu1 %v1020_v49  ;;  %3102 = vmatprep.mubr.msk.bf16.mxu1 %vm3593_vm0, %v3592_v0  ;;  %v1742_v40 = vsel %vm188_vm1, %v1737_v38, 0 }
  0xf7   : > { %3106 = vmatprep.subr.bf16.mxu1 %v3592_v0 }
  0xf8   : > { %v2364_v47 = vpop.permute.xlu0 %2363 }
  0xf9   : > { %3055 = vmatmul.mubr.msk.bf16.vlgmr.msra.gmra.mrb[0].mxu0 %vm184_vm2, %v435_v51  ;;  %v1790_v44 = vpop.permute.xlu1 %1789  ;;  %v2369_v49 = vsel %vm188_vm1, %v2364_v47, 0  ;;  %v1785_v51 = vld [vmem:[#allocation2 + $0xe] sm:$0x3] }
  0xfa   : > { %3059 = vmatpush3.bf16.msra.mxu0 %v496_v52  ;;  %3060 = vmatprep.mubr.msk.bf16.mxu0 %vm3593_vm0, %v3592_v0  ;;  %v1795_v46 = vsel %vm188_vm1, %v1790_v44, 0 }
  0xfb   : > { %3064 = vmatprep.subr.bf16.mxu0 %v3592_v0 }
  0xfc   : > { %v2414_v53 = vpop.permute.xlu0 %2413 }
  0xfd   : > { %v1840_v50 = vpop.permute.xlu1 %1839 }
  0xfe   : > { %v1845_v52 = vsel %vm188_vm1, %v1840_v50, 0 }
 0x101   : > { %3103 = vmatmul.mubr.msk.bf16.vlgmr.msra.gmra.mrb[0].mxu1 %vm184_vm2, %v1010_v54  ;;  %v2362_v54 = vld [vmem:[#allocation2 + $0xc] sm:$0x3] }
 0x102   : > { %3107 = vmatpush3.bf16.msra.mxu1 %v1073_v55  ;;  %3108 = vmatprep.mubr.msk.bf16.mxu1 %vm3593_vm0, %v3592_v0  ;;  %v2419_v55 = vsel %vm188_vm1, %v2414_v53, 0 }
 0x103   : > { %3112 = vmatprep.subr.bf16.mxu1 %v3592_v0 }
 0x105   : > { %3061 = vmatmul.mubr.msk.bf16.vlgmr.msra.gmra.mrb[0].mxu0 %vm184_vm2, %v489_v57  ;;  %v2464_v57 = vpop.permute.xlu0 %2463 }
 0x106   : > { %3065 = vmatpush3.bf16.msra.mxu0 %v550_v58  ;;  %3066 = vmatprep.mubr.msk.bf16.mxu0 %vm3593_vm0, %v3592_v0  ;;  %v2412_v58 = vld [vmem:[#allocation2 + $0xe] sm:$0x3]  ;;  %v2469_v59 = vsel %vm188_vm1, %v2464_v57, 0 }
 0x107   : > { %3070 = vmatprep.subr.bf16.mxu0 %v3592_v0 }
 0x10d   : > { %3109 = vmatmul.mubr.msk.bf16.vlgmr.msra.gmra.mrb[0].mxu1 %vm184_vm2, %v1063_v60  ;;  %v2462_v60 = vld [vmem:[#allocation2 + $0x10] sm:$0x3] }
 0x10e   : > { %3113 = vmatpush3.bf16.msra.mxu1 %v1123_v61  ;;  %3114 = vmatprep.mubr.msk.bf16.mxu1 %vm3593_vm0, %v3592_v0  ;;  %v3597_v61 = vmov 1966171168  }
 0x10f   : > { %3118 = vmatprep.subr.bf16.mxu1 %v3592_v0  ;;  %v646_v62 = vunpack.c.l.s4 %v3597_v61 }
 0x111   : > { %3067 = vmatmul.mubr.msk.bf16.vlgmr.msra.gmra.mrb[0].mxu0 %vm184_vm2, %v540_v63  ;;  %v648_v63 = vlaneseq }
 0x112   : > { %3071 = vmatpush3.bf16.msra.mxu0 %v601_v1  ;;  %3072 = vmatprep.mubr.msk.bf16.mxu0 %vm3593_vm0, %v3592_v0  ;;  %v647_v1 = vunpack.c.0.s8 %v646_v62 }
 0x113   : > { %3130 = vmatprep.subr.bf16.mxu0 %v3592_v0  ;;  %v649_v2 = vshrl.u32 %v648_v63, 7 }
 0x119   : > { %3115 = vmatmul.mubr.msk.bf16.vlgmr.msra.gmra.mrb[0].mxu1 %vm184_vm2, %v1116_v3  ;;  %v4019_v3 = vsub.s32 %v647_v1, %v649_v2 }
 0x11a   : > { %3119 = vmatpush3.bf16.msra.mxu1 %v1173_v4  ;;  %3120 = vmatprep.mubr.msk.bf16.mxu1 %vm3593_vm0, %v3592_v0 }
 0x11b   : > { %3124 = vmatprep.subr.bf16.mxu1 %v3592_v0 }
 0x11d   : > { %3073 = vmatmul.mubr.msk.bf16.vlgmr.msra.gmra.mrb[0].mxu0 %vm184_vm2, %v594_v5 }
 0x11e   : > { %3131 = vmatpush3.bf16.msra.mxu0 %v1436_v6  ;;  %3132 = vmatprep.mubr.msk.bf16.mxu0 %vm3593_vm0, %v3592_v0  ;;  %v4023_v6 = vsub.s32 0, %v649_v2 }
 0x11f   : > { %3136 = vmatprep.subr.bf16.mxu0 %v3592_v0 }
 0x125   : > { %3121 = vmatmul.mubr.msk.bf16.vlgmr.msra.gmra.mrb[0].mxu1 %vm184_vm2, %v1166_v8  ;;  %3133 = vmatmul.mubr.msk.bf16.vlgmr.msra.gmra.mrb[4].mxu0 %vm184_vm2, %v1431_v9 }
 0x126   : > { %3125 = vmatpush3.bf16.msra.mxu1 %v1223_v10  ;;  %3137 = vmatpush3.bf16.msra.mxu0 %v1482_v11 }
 0x127   : > { %3126 = vmatprep.mubr.msk.bf16.mxu1 %vm3593_vm0, %v3592_v0  ;;  %3138 = vmatprep.mubr.msk.bf16.mxu0 %vm3593_vm0, %v3592_v0 }
 0x128   : > { %3184 = vmatprep.subr.bf16.mxu1 %v3592_v0  ;;  %3142 = vmatprep.subr.bf16.mxu0 %v3592_v0 }
 0x131   : > { %3127 = vmatmul.mubr.msk.bf16.vlgmr.msra.gmra.mrb[0].mxu1 %vm184_vm2, %v1216_v14  ;;  %3139 = vmatmul.mubr.msk.bf16.vlgmr.msra.gmra.mrb[4].mxu0 %vm184_vm2, %v1429_v15 }
 0x132   : > { %3185 = vmatpush3.bf16.msra.mxu1 %v2063_v16  ;;  %3186 = vmatprep.mubr.msk.bf16.mxu1 %vm3593_vm0, %v3592_v0 }
 0x133   : > { %3143 = vmatpush3.bf16.msra.mxu0 %v1534_v17  ;;  %3144 = vmatprep.mubr.msk.bf16.mxu0 %vm3593_vm0, %v3592_v0 }
 0x134   : > { %3190 = vmatprep.subr.bf16.mxu1 %v3592_v0  ;;  %3148 = vmatprep.subr.bf16.mxu0 %v3592_v0 }
 0x139   : > { %3187 = vmatmul.mubr.msk.bf16.vlgmr.msra.gmra.mrb[4].mxu1 %vm184_vm2, %v2053_v18 }
 0x13a   : > { %3191 = vmatpush3.bf16.msra.mxu1 %v2109_v20  ;;  %3192 = vmatprep.mubr.msk.bf16.mxu1 %vm3593_vm0, %v3592_v0 }
 0x13b   : > { %3196 = vmatprep.subr.bf16.mxu1 %v3592_v0 }
 0x13d   : > { %3145 = vmatmul.mubr.msk.bf16.vlgmr.msra.gmra.mrb[4].mxu0 %vm184_vm2, %v1524_v22 }
 0x13e   : > { %3149 = vmatpush3.bf16.msra.mxu0 %v1588_v23  ;;  %3150 = vmatprep.mubr.msk.bf16.mxu0 %vm3593_vm0, %v3592_v0 }
 0x13f   : > { %3154 = vmatprep.subr.bf16.mxu0 %v3592_v0 }
 0x145   : > { %3193 = vmatmul.mubr.msk.bf16.vlgmr.msra.gmra.mrb[4].mxu1 %vm184_vm2, %v2051_v24 }
 0x146   : > { %3197 = vmatpush3.bf16.msra.mxu1 %v2161_v25  ;;  %3198 = vmatprep.mubr.msk.bf16.mxu1 %vm3593_vm0, %v3592_v0 }
 0x147   : > { %3202 = vmatprep.subr.bf16.mxu1 %v3592_v0 }
 0x149   : > { %3151 = vmatmul.mubr.msk.bf16.vlgmr.msra.gmra.mrb[4].mxu0 %vm184_vm2, %v1578_v27 }
 0x14a   : > { %3155 = vmatpush3.bf16.msra.mxu0 %v1642_v28  ;;  %3156 = vmatprep.mubr.msk.bf16.mxu0 %vm3593_vm0, %v3592_v0 }
 0x14b   : > { %3160 = vmatprep.subr.bf16.mxu0 %v3592_v0 }
 0x151   : > { %3199 = vmatmul.mubr.msk.bf16.vlgmr.msra.gmra.mrb[4].mxu1 %vm184_vm2, %v2151_v30 }
 0x152   : > { %3203 = vmatpush3.bf16.msra.mxu1 %v2215_v31  ;;  %3204 = vmatprep.mubr.msk.bf16.mxu1 %vm3593_vm0, %v3592_v0 }
 0x153   : > { %3208 = vmatprep.subr.bf16.mxu1 %v3592_v0 }
 0x155   : > { %3157 = vmatmul.mubr.msk.bf16.vlgmr.msra.gmra.mrb[4].mxu0 %vm184_vm2, %v1632_v33 }
 0x156   : > { %3161 = vmatpush3.bf16.msra.mxu0 %v1692_v34  ;;  %3162 = vmatprep.mubr.msk.bf16.mxu0 %vm3593_vm0, %v3592_v0 }
 0x157   : > { %3166 = vmatprep.subr.bf16.mxu0 %v3592_v0 }
 0x15d   : > { %3205 = vmatmul.mubr.msk.bf16.vlgmr.msra.gmra.mrb[4].mxu1 %vm184_vm2, %v2205_v36 }
 0x15e   : > { %3209 = vmatpush3.bf16.msra.mxu1 %v2269_v37  ;;  %3210 = vmatprep.mubr.msk.bf16.mxu1 %vm3593_vm0, %v3592_v0 }
 0x15f   : > { %3214 = vmatprep.subr.bf16.mxu1 %v3592_v0 }
 0x161   : > { %3163 = vmatmul.mubr.msk.bf16.vlgmr.msra.gmra.mrb[4].mxu0 %vm184_vm2, %v1685_v39 }
 0x162   : > { %3167 = vmatpush3.bf16.msra.mxu0 %v1742_v40  ;;  %3168 = vmatprep.mubr.msk.bf16.mxu0 %vm3593_vm0, %v3592_v0 }
 0x163   : > { %3172 = vmatprep.subr.bf16.mxu0 %v3592_v0 }
 0x169   : > { %3211 = vmatmul.mubr.msk.bf16.vlgmr.msra.gmra.mrb[4].mxu1 %vm184_vm2, %v2259_v42 }
 0x16a   : > { %3215 = vmatpush3.bf16.msra.mxu1 %v2319_v43  ;;  %3216 = vmatprep.mubr.msk.bf16.mxu1 %vm3593_vm0, %v3592_v0 }
 0x16b   : > { %3220 = vmatprep.subr.bf16.mxu1 %v3592_v0 }
 0x16d   : > { %3169 = vmatmul.mubr.msk.bf16.vlgmr.msra.gmra.mrb[4].mxu0 %vm184_vm2, %v1735_v45 }
 0x16e   : > { %3173 = vmatpush3.bf16.msra.mxu0 %v1795_v46  ;;  %3174 = vmatprep.mubr.msk.bf16.mxu0 %vm3593_vm0, %v3592_v0 }
 0x16f   : > { %3178 = vmatprep.subr.bf16.mxu0 %v3592_v0 }
 0x175   : > { %3217 = vmatmul.mubr.msk.bf16.vlgmr.msra.gmra.mrb[4].mxu1 %vm184_vm2, %v2312_v48 }
 0x176   : > { %3221 = vmatpush3.bf16.msra.mxu1 %v2369_v49  ;;  %3222 = vmatprep.mubr.msk.bf16.mxu1 %vm3593_vm0, %v3592_v0 }
 0x177   : > { %3226 = vmatprep.subr.bf16.mxu1 %v3592_v0 }
 0x179   : > { %3175 = vmatmul.mubr.msk.bf16.vlgmr.msra.gmra.mrb[4].mxu0 %vm184_vm2, %v1785_v51 }
 0x17a   : > { %3179 = vmatpush3.bf16.msra.mxu0 %v1845_v52  ;;  %3180 = vmatprep.mubr.msk.bf16.mxu0 %vm3593_vm0, %v3592_v0 }
 0x181   : > { %3223 = vmatmul.mubr.msk.bf16.vlgmr.msra.gmra.mrb[4].mxu1 %vm184_vm2, %v2362_v54 }
 0x182   : > { %3227 = vmatpush3.bf16.msra.mxu1 %v2419_v55  ;;  %3228 = vmatprep.mubr.msk.bf16.mxu1 %vm3593_vm0, %v3592_v0 }
 0x183   : > { %3232 = vmatprep.subr.bf16.mxu1 %v3592_v0 }
 0x185   : > { %3181 = vmatmul.mubr.msk.bf16.vlgmr.msra.gmra.mrb[4].mxu0 %vm184_vm2, %v1838_v56 }
 0x18d   : > { %3229 = vmatmul.mubr.msk.bf16.vlgmr.msra.gmra.mrb[4].mxu1 %vm184_vm2, %v2412_v58 }
 0x18e   : > { %3233 = vmatpush3.bf16.msra.mxu1 %v2469_v59  ;;  %3234 = vmatprep.mubr.msk.bf16.mxu1 %vm3593_vm0, %v3592_v0 }
 0x199   : > { %3235 = vmatmul.mubr.msk.bf16.vlgmr.msra.gmra.mrb[4].mxu1 %vm184_vm2, %v2462_v60 }
 0x1f0   : > { %v637_v4 = vpop.f32.mrb[0].mxu0 }
 0x1f1   : > { %v651_v5 = vrot.slane %v637_v4, %v4019_v3  ;;  %v3074_v7 = vpop.f32.mrb[1].mxu0 }
 0x1f2   : > { %v640_v8 = vpop.f32.mrb[2].mxu0 }
 0x1f3   : > { %v652_v0 = vcombine.high %v651_v5, %v651_v5  ;;  %v659_v9 = vrot.slane %v651_v5, %v4019_v3  ;;  %v3075_v10 = vpop.f32.mrb[3].mxu0 }
 0x1f5   : > { %v666_v11 = vrot.slane %v652_v0, %v4019_v3  ;;  %v667_v12 = vcombine.high %v659_v9, %v659_v9  ;;  %674 = vst.msk [vmem:[%s4027_s23] sm:$0x1] %vm673_vm3, %v659_v9  ;;  %v681_v13 = vrot.slane %v659_v9, %v4023_v6 }
 0x1f7   : > { %v668_v14 = vcombine.high %v666_v11, %v666_v11  ;;  %675 = vst.msk [vmem:[%s4027_s23 + $0x20] sm:$0x1] %vm673_vm3, %v666_v11  ;;  %676 = vst.msk [vmem:[%s4027_s23 + $0x40] sm:$0x1] %vm673_vm3, %v667_v12  ;;  %v685_v15 = vrot.slane %v666_v11, %v4023_v6  ;;  %694 = vrot.lane.b32.xlu1 %v681_v13, %s3595_s17  ;;  %v689_v26 = vrot.slane %v667_v12, %v4023_v6 }
 0x1f9   : > { %677 = vst.msk [vmem:[%s4027_s23 + $0x60] sm:$0x1] %vm673_vm3, %v668_v14  ;;  %696 = vrot.lane.b32.xlu0 %v685_v15, %s3595_s17  ;;  %v693_v27 = vrot.slane %v668_v14, %v4023_v6 }
 0x1fb   : > { %710 = vrot.lane.b32.xlu1 %v681_v13, %s3598_s28 }
 0x1fd   : > { %712 = vrot.lane.b32.xlu0 %v685_v15, %s3598_s28 }
 0x1ff   : > { %726 = vrot.lane.b32.xlu1 %v681_v13, %s3599_s4 }
 0x201   : > { %728 = vrot.lane.b32.xlu0 %v685_v15, %s3599_s4 }
 0x203   : > { %742 = vrot.lane.b32.xlu1 %v681_v13, %s3600_s5 }
 0x204   : > { %v1259_v16 = vpop.f32.mrb[0].mxu1 }
 0x205   : > { %v1273_v17 = vrot.slane %v1259_v16, %v4019_v3  ;;  %v3128_v18 = vpop.f32.mrb[1].mxu1  ;;  %744 = vrot.lane.b32.xlu0 %v685_v15, %s3600_s5 }
 0x206   : > { %v1262_v20 = vpop.f32.mrb[2].mxu1 }
 0x207   : > { %v1274_v21 = vcombine.high %v1273_v17, %v1273_v17  ;;  %v1281_v22 = vrot.slane %v1273_v17, %v4019_v3  ;;  %v3129_v23 = vpop.f32.mrb[3].mxu1  ;;  %758 = vrot.lane.b32.xlu1 %v681_v13, %s3601_s6 }
 0x209   : > { %v1288_v19 = vrot.slane %v1274_v21, %v4019_v3  ;;  %v1289_v24 = vcombine.high %v1281_v22, %v1281_v22  ;;  %2815 = vst.msk [vmem:[%s4027_s23 + $0x8] sm:$0x1] %vm673_vm3, %v1281_v22  ;;  %760 = vrot.lane.b32.xlu0 %v685_v15, %s3601_s6  ;;  %v1303_v28 = vrot.slane %v1281_v22, %v4023_v6 }
 0x20b   : > { %v1290_v25 = vcombine.high %v1288_v19, %v1288_v19  ;;  %2816 = vst.msk [vmem:[%s4027_s23 + $0x28] sm:$0x1] %vm673_vm3, %v1288_v19  ;;  %2817 = vst.msk [vmem:[%s4027_s23 + $0x48] sm:$0x1] %vm673_vm3, %v1289_v24  ;;  %774 = vrot.lane.b32.xlu1 %v681_v13, %s3602_s7  ;;  %v1307_v29 = vrot.slane %v1288_v19, %v4023_v6  ;;  %v1311_v30 = vrot.slane %v1289_v24, %v4023_v6 }
 0x20d   : > { %2818 = vst.msk [vmem:[%s4027_s23 + $0x68] sm:$0x1] %vm673_vm3, %v1290_v25  ;;  %776 = vrot.lane.b32.xlu0 %v685_v15, %s3602_s7  ;;  %v1315_v31 = vrot.slane %v1290_v25, %v4023_v6 }
 0x20f   : > { %790 = vrot.lane.b32.xlu1 %v681_v13, %s3603_s18 }
 0x211   : > { %792 = vrot.lane.b32.xlu0 %v685_v15, %s3603_s18 }
 0x213   : > { %698 = vrot.lane.b32.xlu1 %v689_v26, %s3595_s17 }
 0x215   : > { %700 = vrot.lane.b32.xlu0 %v693_v27, %s3595_s17 }
 0x217   : > { %714 = vrot.lane.b32.xlu1 %v689_v26, %s3598_s28 }
 0x219   : > { %716 = vrot.lane.b32.xlu0 %v693_v27, %s3598_s28 }
 0x21b   : > { %730 = vrot.lane.b32.xlu1 %v689_v26, %s3599_s4 }
 0x21d   : > { %732 = vrot.lane.b32.xlu0 %v693_v27, %s3599_s4 }
 0x21f   : > { %746 = vrot.lane.b32.xlu1 %v689_v26, %s3600_s5 }
 0x221   : > { %748 = vrot.lane.b32.xlu0 %v693_v27, %s3600_s5 }
 0x223   : > { %762 = vrot.lane.b32.xlu1 %v689_v26, %s3601_s6 }
 0x225   : > { %764 = vrot.lane.b32.xlu0 %v693_v27, %s3601_s6 }
 0x227   : > { %778 = vrot.lane.b32.xlu1 %v689_v26, %s3602_s7 }
 0x229   : > { %780 = vrot.lane.b32.xlu0 %v693_v27, %s3602_s7 }
 0x22b   : > { %794 = vrot.lane.b32.xlu1 %v689_v26, %s3603_s18 }
 0x22d   : > { %796 = vrot.lane.b32.xlu0 %v693_v27, %s3603_s18 }
 0x22f   : > { %1316 = vrot.lane.b32.xlu1 %v1303_v28, %s3595_s17 }
 0x231   : > { %1318 = vrot.lane.b32.xlu0 %v1307_v29, %s3595_s17 }
 0x233   : > { %1332 = vrot.lane.b32.xlu1 %v1303_v28, %s3598_s28 }
 0x235   : > { %1334 = vrot.lane.b32.xlu0 %v1307_v29, %s3598_s28 }
 0x237   : > { %1348 = vrot.lane.b32.xlu1 %v1303_v28, %s3599_s4 }
 0x239   : > { %1350 = vrot.lane.b32.xlu0 %v1307_v29, %s3599_s4 }
 0x23b   : > { %1364 = vrot.lane.b32.xlu1 %v1303_v28, %s3600_s5 }
 0x23d   : > { %1366 = vrot.lane.b32.xlu0 %v1307_v29, %s3600_s5 }
 0x23f   : > { %1380 = vrot.lane.b32.xlu1 %v1303_v28, %s3601_s6 }
 0x241   : > { %1382 = vrot.lane.b32.xlu0 %v1307_v29, %s3601_s6 }
 0x243   : > { %1396 = vrot.lane.b32.xlu1 %v1303_v28, %s3602_s7 }
 0x245   : > { %1398 = vrot.lane.b32.xlu0 %v1307_v29, %s3602_s7 }
 0x247   : > { %1412 = vrot.lane.b32.xlu1 %v1303_v28, %s3603_s18 }
 0x249   : > { %1414 = vrot.lane.b32.xlu0 %v1307_v29, %s3603_s18 }
 0x24b   : > { %1320 = vrot.lane.b32.xlu1 %v1311_v30, %s3595_s17 }
 0x24d   : > { %1322 = vrot.lane.b32.xlu0 %v1315_v31, %s3595_s17 }
 0x24f   : > { %1336 = vrot.lane.b32.xlu1 %v1311_v30, %s3598_s28 }
 0x251   : > { %1338 = vrot.lane.b32.xlu0 %v1315_v31, %s3598_s28 }
 0x253   : > { %1352 = vrot.lane.b32.xlu1 %v1311_v30, %s3599_s4 }
 0x255   : > { %1354 = vrot.lane.b32.xlu0 %v1315_v31, %s3599_s4 }
 0x257   : > { %1368 = vrot.lane.b32.xlu1 %v1311_v30, %s3600_s5 }
 0x258   : > { %v1881_v32 = vpop.f32.mrb[4].mxu0 }
 0x259   : > { %v1895_v33 = vrot.slane %v1881_v32, %v4019_v3  ;;  %1370 = vrot.lane.b32.xlu0 %v1315_v31, %s3600_s5  ;;  %v3182_v34 = vpop.f32.mrb[5].mxu0 }
 0x25a   : > { %v1884_v35 = vpop.f32.mrb[6].mxu0 }
 0x25b   : > { %v1896_v36 = vcombine.high %v1895_v33, %v1895_v33  ;;  %v1903_v37 = vrot.slane %v1895_v33, %v4019_v3  ;;  %1384 = vrot.lane.b32.xlu1 %v1311_v30, %s3601_s6  ;;  %v3183_v38 = vpop.f32.mrb[7].mxu0 }
 0x25d   : > { %v1910_v39 = vrot.slane %v1896_v36, %v4019_v3  ;;  %v4110_v40 = vcombine.high %v1903_v37, %v1903_v37  ;;  %2863 = vst.msk [vmem:[%s4027_s23 + $0x10] sm:$0x1] %vm673_vm3, %v1903_v37  ;;  %1386 = vrot.lane.b32.xlu0 %v1315_v31, %s3601_s6  ;;  %v1925_v42 = vrot.slane %v1903_v37, %v4023_v6 }
 0x25f   : > { %v4115_v41 = vcombine.high %v1910_v39, %v1910_v39  ;;  %2864 = vst.msk [vmem:[%s4027_s23 + $0x30] sm:$0x1] %vm673_vm3, %v1910_v39  ;;  %2865 = vst.msk [vmem:[%s4027_s23 + $0x50] sm:$0x1] %vm673_vm3, %v4110_v40  ;;  %1400 = vrot.lane.b32.xlu1 %v1311_v30, %s3602_s7  ;;  %v1929_v43 = vrot.slane %v1910_v39, %v4023_v6 }
 0x261   : > { %2866 = vst.msk [vmem:[%s4027_s23 + $0x70] sm:$0x1] %vm673_vm3, %v4115_v41  ;;  %1402 = vrot.lane.b32.xlu0 %v1315_v31, %s3602_s7  ;;  %v1937_v5 = vrot.slane %v4115_v41, %v4023_v6 }
 0x263   : > { %1416 = vrot.lane.b32.xlu1 %v1311_v30, %s3603_s18 }
 0x265   : > { %1418 = vrot.lane.b32.xlu0 %v1315_v31, %s3603_s18 }
 0x267   : > { %1938 = vrot.lane.b32.xlu1 %v1925_v42, %s3595_s17 }
 0x269   : > { %v695_v44 = vpop.permute.xlu1 %694  ;;  %1940 = vrot.lane.b32.xlu0 %v1929_v43, %s3595_s17 }
 0x26a   : > { %706 = vst.msk [vmem:[%s4027_s23 + $0x1] sm:$0x1] %vm673_vm3, %v695_v44 }
 0x26b   : > { %v697_v45 = vpop.permute.xlu0 %696  ;;  %1954 = vrot.lane.b32.xlu1 %v1925_v42, %s3598_s28 }
 0x26c   : > { %707 = vst.msk [vmem:[%s4027_s23 + $0x21] sm:$0x1] %vm673_vm3, %v697_v45  ;;  %v2505_v46 = vpop.f32.mrb[4].mxu1 }
 0x26d   : > { %v2519_v47 = vrot.slane %v2505_v46, %v4019_v3  ;;  %v3236_v48 = vpop.f32.mrb[5].mxu1  ;;  %v711_v49 = vpop.permute.xlu1 %710  ;;  %1956 = vrot.lane.b32.xlu0 %v1929_v43, %s3598_s28 }
 0x26e   : > { %722 = vst.msk [vmem:[%s4027_s23 + $0x2] sm:$0x1] %vm673_vm3, %v711_v49  ;;  %v2508_v50 = vpop.f32.mrb[6].mxu1 }
 0x26f   : > { %v2520_v51 = vcombine.high %v2519_v47, %v2519_v47  ;;  %v4143_v52 = vrot.slane %v2519_v47, %v4019_v3  ;;  %v3237_v53 = vpop.f32.mrb[7].mxu1  ;;  %v713_v54 = vpop.permute.xlu0 %712  ;;  %1970 = vrot.lane.b32.xlu1 %v1925_v42, %s3599_s4 }
 0x270   : > { %723 = vst.msk [vmem:[%s4027_s23 + $0x22] sm:$0x1] %vm673_vm3, %v713_v54 }
 0x271   : > { %v4149_v55 = vrot.slane %v2520_v51, %v4019_v3  ;;  %v4153_v56 = vcombine.high %v4143_v52, %v4143_v52  ;;  %2911 = vst.msk [vmem:[%s4027_s23 + $0x18] sm:$0x1] %vm673_vm3, %v4143_v52  ;;  %v727_v57 = vpop.permute.xlu1 %726  ;;  %1972 = vrot.lane.b32.xlu0 %v1929_v43, %s3599_s4  ;;  %v1933_v3 = vrot.slane %v4110_v40, %v4023_v6 }
 0x272   : > { %738 = vst.msk [vmem:[%s4027_s23 + $0x3] sm:$0x1] %vm673_vm3, %v727_v57  ;;  %v2549_v20 = vrot.slane %v4143_v52, %v4023_v6 }
 0x273   : > { %v4163_v58 = vcombine.high %v4149_v55, %v4149_v55  ;;  %2912 = vst.msk [vmem:[%s4027_s23 + $0x38] sm:$0x1] %vm673_vm3, %v4149_v55  ;;  %2913 = vst.msk [vmem:[%s4027_s23 + $0x58] sm:$0x1] %vm673_vm3, %v4153_v56  ;;  %v729_v59 = vpop.permute.xlu0 %728  ;;  %1986 = vrot.lane.b32.xlu1 %v1925_v42, %s3600_s5  ;;  %v2553_v22 = vrot.slane %v4149_v55, %v4023_v6  ;;  %v2557_v35 = vrot.slane %v4153_v56, %v4023_v6 }
 0x274   : > { %739 = vst.msk [vmem:[%s4027_s23 + $0x23] sm:$0x1] %vm673_vm3, %v729_v59 }
 0x275   : > { %2914 = vst.msk [vmem:[%s4027_s23 + $0x78] sm:$0x1] %vm673_vm3, %v4163_v58  ;;  %v743_v60 = vpop.permute.xlu1 %742  ;;  %1988 = vrot.lane.b32.xlu0 %v1929_v43, %s3600_s5  ;;  %v2561_v37 = vrot.slane %v4163_v58, %v4023_v6 }
 0x276   : > { %754 = vst.msk [vmem:[%s4027_s23 + $0x4] sm:$0x1] %vm673_vm3, %v743_v60 }
 0x277   : > { %v745_v61 = vpop.permute.xlu0 %744  ;;  %2002 = vrot.lane.b32.xlu1 %v1925_v42, %s3601_s6 }
 0x278   : > { %755 = vst.msk [vmem:[%s4027_s23 + $0x24] sm:$0x1] %vm673_vm3, %v745_v61 }
 0x279   : > { %v759_v62 = vpop.permute.xlu1 %758  ;;  %2004 = vrot.lane.b32.xlu0 %v1929_v43, %s3601_s6 }
 0x27a   : > { %770 = vst.msk [vmem:[%s4027_s23 + $0x5] sm:$0x1] %vm673_vm3, %v759_v62 }
 0x27b   : > { %v761_v63 = vpop.permute.xlu0 %760  ;;  %2018 = vrot.lane.b32.xlu1 %v1925_v42, %s3602_s7 }
 0x27c   : > { %771 = vst.msk [vmem:[%s4027_s23 + $0x25] sm:$0x1] %vm673_vm3, %v761_v63 }
 0x27d   : > { %v775_v1 = vpop.permute.xlu1 %774  ;;  %2020 = vrot.lane.b32.xlu0 %v1929_v43, %s3602_s7 }
 0x27e   : > { %786 = vst.msk [vmem:[%s4027_s23 + $0x6] sm:$0x1] %vm673_vm3, %v775_v1 }
 0x27f   : > { %v777_v2 = vpop.permute.xlu0 %776  ;;  %2034 = vrot.lane.b32.xlu1 %v1925_v42, %s3603_s18 }
 0x280   : > { %787 = vst.msk [vmem:[%s4027_s23 + $0x26] sm:$0x1] %vm673_vm3, %v777_v2 }
 0x281   : > { %v791_v4 = vpop.permute.xlu1 %790  ;;  %2036 = vrot.lane.b32.xlu0 %v1929_v43, %s3603_s18 }
 0x282   : > { %802 = vst.msk [vmem:[%s4027_s23 + $0x7] sm:$0x1] %vm673_vm3, %v791_v4 }
 0x283   : > { %v793_v7 = vpop.permute.xlu0 %792  ;;  %1942 = vrot.lane.b32.xlu1 %v1933_v3, %s3595_s17 }
 0x284   : > { %803 = vst.msk [vmem:[%s4027_s23 + $0x27] sm:$0x1] %vm673_vm3, %v793_v7 }
 0x285   : > { %v699_v8 = vpop.permute.xlu1 %698  ;;  %1944 = vrot.lane.b32.xlu0 %v1937_v5, %s3595_s17 }
 0x286   : > { %708 = vst.msk [vmem:[%s4027_s23 + $0x41] sm:$0x1] %vm673_vm3, %v699_v8 }
 0x287   : > { %v701_v0 = vpop.permute.xlu0 %700  ;;  %1958 = vrot.lane.b32.xlu1 %v1933_v3, %s3598_s28 }
 0x288   : > { %709 = vst.msk [vmem:[%s4027_s23 + $0x61] sm:$0x1] %vm673_vm3, %v701_v0 }
 0x289   : > { %v715_v9 = vpop.permute.xlu1 %714  ;;  %1960 = vrot.lane.b32.xlu0 %v1937_v5, %s3598_s28 }
 0x28a   : > { %724 = vst.msk [vmem:[%s4027_s23 + $0x42] sm:$0x1] %vm673_vm3, %v715_v9 }
 0x28b   : > { %v717_v10 = vpop.permute.xlu0 %716  ;;  %1974 = vrot.lane.b32.xlu1 %v1933_v3, %s3599_s4 }
 0x28c   : > { %725 = vst.msk [vmem:[%s4027_s23 + $0x62] sm:$0x1] %vm673_vm3, %v717_v10 }
 0x28d   : > { %v731_v11 = vpop.permute.xlu1 %730  ;;  %1976 = vrot.lane.b32.xlu0 %v1937_v5, %s3599_s4 }
 0x28e   : > { %740 = vst.msk [vmem:[%s4027_s23 + $0x43] sm:$0x1] %vm673_vm3, %v731_v11 }
 0x28f   : > { %v733_v12 = vpop.permute.xlu0 %732  ;;  %1990 = vrot.lane.b32.xlu1 %v1933_v3, %s3600_s5 }
 0x290   : > { %741 = vst.msk [vmem:[%s4027_s23 + $0x63] sm:$0x1] %vm673_vm3, %v733_v12 }
 0x291   : > { %v747_v13 = vpop.permute.xlu1 %746  ;;  %1992 = vrot.lane.b32.xlu0 %v1937_v5, %s3600_s5 }
 0x292   : > { %756 = vst.msk [vmem:[%s4027_s23 + $0x44] sm:$0x1] %vm673_vm3, %v747_v13 }
 0x293   : > { %v749_v14 = vpop.permute.xlu0 %748  ;;  %2006 = vrot.lane.b32.xlu1 %v1933_v3, %s3601_s6 }
 0x294   : > { %757 = vst.msk [vmem:[%s4027_s23 + $0x64] sm:$0x1] %vm673_vm3, %v749_v14 }
 0x295   : > { %v763_v15 = vpop.permute.xlu1 %762  ;;  %2008 = vrot.lane.b32.xlu0 %v1937_v5, %s3601_s6 }
 0x296   : > { %772 = vst.msk [vmem:[%s4027_s23 + $0x45] sm:$0x1] %vm673_vm3, %v763_v15 }
 0x297   : > { %v765_v16 = vpop.permute.xlu0 %764  ;;  %2022 = vrot.lane.b32.xlu1 %v1933_v3, %s3602_s7 }
 0x298   : > { %773 = vst.msk [vmem:[%s4027_s23 + $0x65] sm:$0x1] %vm673_vm3, %v765_v16 }
 0x299   : > { %v779_v17 = vpop.permute.xlu1 %778  ;;  %2024 = vrot.lane.b32.xlu0 %v1937_v5, %s3602_s7 }
 0x29a   : > { %788 = vst.msk [vmem:[%s4027_s23 + $0x46] sm:$0x1] %vm673_vm3, %v779_v17 }
 0x29b   : > { %v781_v18 = vpop.permute.xlu0 %780  ;;  %2038 = vrot.lane.b32.xlu1 %v1933_v3, %s3603_s18 }
 0x29c   : > { %789 = vst.msk [vmem:[%s4027_s23 + $0x66] sm:$0x1] %vm673_vm3, %v781_v18 }
 0x29d   : > { %v795_v21 = vpop.permute.xlu1 %794  ;;  %2040 = vrot.lane.b32.xlu0 %v1937_v5, %s3603_s18 }
 0x29e   : > { %804 = vst.msk [vmem:[%s4027_s23 + $0x47] sm:$0x1] %vm673_vm3, %v795_v21 }
 0x29f   : > { %v797_v23 = vpop.permute.xlu0 %796  ;;  %2562 = vrot.lane.b32.xlu1 %v2549_v20, %s3595_s17 }
 0x2a0   : > { %805 = vst.msk [vmem:[%s4027_s23 + $0x67] sm:$0x1] %vm673_vm3, %v797_v23 }
 0x2a1   : > { %v1317_v19 = vpop.permute.xlu1 %1316  ;;  %2564 = vrot.lane.b32.xlu0 %v2553_v22, %s3595_s17 }
 0x2a2   : > { %2819 = vst.msk [vmem:[%s4027_s23 + $0x9] sm:$0x1] %vm673_vm3, %v1317_v19 }
 0x2a3   : > { %v1319_v24 = vpop.permute.xlu0 %1318  ;;  %2578 = vrot.lane.b32.xlu1 %v2549_v20, %s3598_s28 }
 0x2a4   : > { %2820 = vst.msk [vmem:[%s4027_s23 + $0x29] sm:$0x1] %vm673_vm3, %v1319_v24 }
 0x2a5   : > { %v1333_v25 = vpop.permute.xlu1 %1332  ;;  %2580 = vrot.lane.b32.xlu0 %v2553_v22, %s3598_s28 }
 0x2a6   : > { %2823 = vst.msk [vmem:[%s4027_s23 + $0xa] sm:$0x1] %vm673_vm3, %v1333_v25 }
 0x2a7   : > { %v1335_v26 = vpop.permute.xlu0 %1334  ;;  %2594 = vrot.lane.b32.xlu1 %v2549_v20, %s3599_s4 }
 0x2a8   : > { %2824 = vst.msk [vmem:[%s4027_s23 + $0x2a] sm:$0x1] %vm673_vm3, %v1335_v26 }
 0x2a9   : > { %v1349_v27 = vpop.permute.xlu1 %1348  ;;  %2596 = vrot.lane.b32.xlu0 %v2553_v22, %s3599_s4 }
 0x2aa   : > { %2827 = vst.msk [vmem:[%s4027_s23 + $0xb] sm:$0x1] %vm673_vm3, %v1349_v27 }
 0x2ab   : > { %v1351_v28 = vpop.permute.xlu0 %1350  ;;  %2610 = vrot.lane.b32.xlu1 %v2549_v20, %s3600_s5 }
 0x2ac   : > { %2828 = vst.msk [vmem:[%s4027_s23 + $0x2b] sm:$0x1] %vm673_vm3, %v1351_v28 }
 0x2ad   : > { %v1365_v29 = vpop.permute.xlu1 %1364  ;;  %2612 = vrot.lane.b32.xlu0 %v2553_v22, %s3600_s5 }
 0x2ae   : > { %2831 = vst.msk [vmem:[%s4027_s23 + $0xc] sm:$0x1] %vm673_vm3, %v1365_v29 }
 0x2af   : > { %v1367_v30 = vpop.permute.xlu0 %1366  ;;  %2626 = vrot.lane.b32.xlu1 %v2549_v20, %s3601_s6 }
 0x2b0   : > { %2832 = vst.msk [vmem:[%s4027_s23 + $0x2c] sm:$0x1] %vm673_vm3, %v1367_v30 }
 0x2b1   : > { %v1381_v31 = vpop.permute.xlu1 %1380  ;;  %2628 = vrot.lane.b32.xlu0 %v2553_v22, %s3601_s6 }
 0x2b2   : > { %2835 = vst.msk [vmem:[%s4027_s23 + $0xd] sm:$0x1] %vm673_vm3, %v1381_v31 }
 0x2b3   : > { %v1383_v32 = vpop.permute.xlu0 %1382  ;;  %2642 = vrot.lane.b32.xlu1 %v2549_v20, %s3602_s7 }
 0x2b4   : > { %2836 = vst.msk [vmem:[%s4027_s23 + $0x2d] sm:$0x1] %vm673_vm3, %v1383_v32 }
 0x2b5   : > { %v1397_v33 = vpop.permute.xlu1 %1396  ;;  %2644 = vrot.lane.b32.xlu0 %v2553_v22, %s3602_s7 }
 0x2b6   : > { %2839 = vst.msk [vmem:[%s4027_s23 + $0xe] sm:$0x1] %vm673_vm3, %v1397_v33 }
 0x2b7   : > { %v1399_v34 = vpop.permute.xlu0 %1398  ;;  %2658 = vrot.lane.b32.xlu1 %v2549_v20, %s3603_s18 }
 0x2b8   : > { %2840 = vst.msk [vmem:[%s4027_s23 + $0x2e] sm:$0x1] %vm673_vm3, %v1399_v34 }
 0x2b9   : > { %v1413_v36 = vpop.permute.xlu1 %1412  ;;  %2660 = vrot.lane.b32.xlu0 %v2553_v22, %s3603_s18 }
 0x2ba   : > { %2843 = vst.msk [vmem:[%s4027_s23 + $0xf] sm:$0x1] %vm673_vm3, %v1413_v36 }
 0x2bb   : > { %v1415_v38 = vpop.permute.xlu0 %1414  ;;  %2566 = vrot.lane.b32.xlu1 %v2557_v35, %s3595_s17 }
 0x2bc   : > { %2844 = vst.msk [vmem:[%s4027_s23 + $0x2f] sm:$0x1] %vm673_vm3, %v1415_v38 }
 0x2bd   : > { %v1321_v39 = vpop.permute.xlu1 %1320  ;;  %2568 = vrot.lane.b32.xlu0 %v2561_v37, %s3595_s17  ;;  %s3520_s17 = scalar_lea.vmem %s3519_s15, 4096 }
 0x2be   : > { %2821 = vst.msk [vmem:[%s4027_s23 + $0x49] sm:$0x1] %vm673_vm3, %v1321_v39  ;;  %p3522_p13 = scmp.lt.s32.totalorder %s3520_s17, %s3514_s30 }
 0x2bf   : > { %v1323_v40 = vpop.permute.xlu0 %1322  ;;  %2582 = vrot.lane.b32.xlu1 %v2557_v35, %s3598_s28 }
 0x2c0   : > { %2822 = vst.msk [vmem:[%s4027_s23 + $0x69] sm:$0x1] %vm673_vm3, %v1323_v40  ;;  %p3523_p3 = por %p3522_p13, %p3521_p10 }
 0x2c1   : > { %v1337_v41 = vpop.permute.xlu1 %1336  ;;  %2584 = vrot.lane.b32.xlu0 %v2561_v37, %s3598_s28 }
 0x2c2   : > { %2825 = vst.msk [vmem:[%s4027_s23 + $0x4a] sm:$0x1] %vm673_vm3, %v1337_v41  ;;  %p3524_p7 = pnand %p3523_p3, %p3517_p8 }
 0x2c3   : > { %v1339_v6 = vpop.permute.xlu0 %1338  ;;  %2598 = vrot.lane.b32.xlu1 %v2557_v35, %s3599_s4 }
 0x2c4   : > { %2826 = vst.msk [vmem:[%s4027_s23 + $0x6a] sm:$0x1] %vm673_vm3, %v1339_v6 }
 0x2c5   : > { %v1353_v42 = vpop.permute.xlu1 %1352  ;;  %2600 = vrot.lane.b32.xlu0 %v2561_v37, %s3599_s4 }
 0x2c6   : > { %2829 = vst.msk [vmem:[%s4027_s23 + $0x4b] sm:$0x1] %vm673_vm3, %v1353_v42 }
 0x2c7   : > { %v1355_v43 = vpop.permute.xlu0 %1354  ;;  %2614 = vrot.lane.b32.xlu1 %v2557_v35, %s3600_s5 }
 0x2c8   : > { %2830 = vst.msk [vmem:[%s4027_s23 + $0x6b] sm:$0x1] %vm673_vm3, %v1355_v43 }
 0x2c9   : > { %v1369_v44 = vpop.permute.xlu1 %1368  ;;  %2616 = vrot.lane.b32.xlu0 %v2561_v37, %s3600_s5 }
 0x2ca   : > { %2833 = vst.msk [vmem:[%s4027_s23 + $0x4c] sm:$0x1] %vm673_vm3, %v1369_v44 }
 0x2cb   : > { %v1371_v45 = vpop.permute.xlu0 %1370  ;;  %2630 = vrot.lane.b32.xlu1 %v2557_v35, %s3601_s6 }
 0x2cc   : > { %2834 = vst.msk [vmem:[%s4027_s23 + $0x6c] sm:$0x1] %vm673_vm3, %v1371_v45 }
 0x2cd   : > { %v1385_v46 = vpop.permute.xlu1 %1384  ;;  %2632 = vrot.lane.b32.xlu0 %v2561_v37, %s3601_s6 }
 0x2ce   : > { %2837 = vst.msk [vmem:[%s4027_s23 + $0x4d] sm:$0x1] %vm673_vm3, %v1385_v46 }
 0x2cf   : > { %v1387_v47 = vpop.permute.xlu0 %1386  ;;  %2646 = vrot.lane.b32.xlu1 %v2557_v35, %s3602_s7 }
 0x2d0   : > { %2838 = vst.msk [vmem:[%s4027_s23 + $0x6d] sm:$0x1] %vm673_vm3, %v1387_v47 }
 0x2d1   : > { %v1401_v48 = vpop.permute.xlu1 %1400  ;;  %2648 = vrot.lane.b32.xlu0 %v2561_v37, %s3602_s7 }
 0x2d2   : > { %2841 = vst.msk [vmem:[%s4027_s23 + $0x4e] sm:$0x1] %vm673_vm3, %v1401_v48 }
 0x2d3   : > { %v1403_v49 = vpop.permute.xlu0 %1402  ;;  %2662 = vrot.lane.b32.xlu1 %v2557_v35, %s3603_s18 }
 0x2d4   : > { %2842 = vst.msk [vmem:[%s4027_s23 + $0x6e] sm:$0x1] %vm673_vm3, %v1403_v49 }
 0x2d5   : > { %v1417_v50 = vpop.permute.xlu1 %1416  ;;  %2664 = vrot.lane.b32.xlu0 %v2561_v37, %s3603_s18 }
 0x2d6   : > { %2845 = vst.msk [vmem:[%s4027_s23 + $0x4f] sm:$0x1] %vm673_vm3, %v1417_v50 }
 0x2d7   : > { %v1419_v51 = vpop.permute.xlu0 %1418 }
 0x2d8   : > { %2846 = vst.msk [vmem:[%s4027_s23 + $0x6f] sm:$0x1] %vm673_vm3, %v1419_v51 }
 0x2d9   : > { %v1939_v52 = vpop.permute.xlu1 %1938 }
 0x2da   : > { %2867 = vst.msk [vmem:[%s4027_s23 + $0x11] sm:$0x1] %vm673_vm3, %v1939_v52 }
 0x2db   : > { %v1941_v53 = vpop.permute.xlu0 %1940 }
 0x2dc   : > { %2868 = vst.msk [vmem:[%s4027_s23 + $0x31] sm:$0x1] %vm673_vm3, %v1941_v53 }
 0x2dd   : > { %v1955_v54 = vpop.permute.xlu1 %1954 }
 0x2de   : > { %2871 = vst.msk [vmem:[%s4027_s23 + $0x12] sm:$0x1] %vm673_vm3, %v1955_v54 }
 0x2df   : > { %v1957_v55 = vpop.permute.xlu0 %1956 }
 0x2e0   : > { %2872 = vst.msk [vmem:[%s4027_s23 + $0x32] sm:$0x1] %vm673_vm3, %v1957_v55 }
 0x2e1   : > { %v1971_v56 = vpop.permute.xlu1 %1970 }
 0x2e2   : > { %2875 = vst.msk [vmem:[%s4027_s23 + $0x13] sm:$0x1] %vm673_vm3, %v1971_v56 }
 0x2e3   : > { %v1973_v57 = vpop.permute.xlu0 %1972 }
 0x2e4   : > { %2876 = vst.msk [vmem:[%s4027_s23 + $0x33] sm:$0x1] %vm673_vm3, %v1973_v57 }
 0x2e5   : > { %v1987_v58 = vpop.permute.xlu1 %1986 }
 0x2e6   : > { %2879 = vst.msk [vmem:[%s4027_s23 + $0x14] sm:$0x1] %vm673_vm3, %v1987_v58 }
 0x2e7   : > { %v1989_v59 = vpop.permute.xlu0 %1988 }
 0x2e8   : > { %2880 = vst.msk [vmem:[%s4027_s23 + $0x34] sm:$0x1] %vm673_vm3, %v1989_v59 }
 0x2e9   : > { %v2003_v60 = vpop.permute.xlu1 %2002 }
 0x2ea   : > { %2883 = vst.msk [vmem:[%s4027_s23 + $0x15] sm:$0x1] %vm673_vm3, %v2003_v60 }
 0x2eb   : > { %v2005_v61 = vpop.permute.xlu0 %2004 }
 0x2ec   : > { %2884 = vst.msk [vmem:[%s4027_s23 + $0x35] sm:$0x1] %vm673_vm3, %v2005_v61 }
 0x2ed   : > { %v2019_v62 = vpop.permute.xlu1 %2018 }
 0x2ee   : > { %2887 = vst.msk [vmem:[%s4027_s23 + $0x16] sm:$0x1] %vm673_vm3, %v2019_v62 }
 0x2ef   : > { %v2021_v63 = vpop.permute.xlu0 %2020 }
 0x2f0   : > { %2888 = vst.msk [vmem:[%s4027_s23 + $0x36] sm:$0x1] %vm673_vm3, %v2021_v63 }
 0x2f1   : > { %v2035_v1 = vpop.permute.xlu1 %2034 }
 0x2f2   : > { %2891 = vst.msk [vmem:[%s4027_s23 + $0x17] sm:$0x1] %vm673_vm3, %v2035_v1 }
 0x2f3   : > { %v2037_v2 = vpop.permute.xlu0 %2036 }
 0x2f4   : > { %2892 = vst.msk [vmem:[%s4027_s23 + $0x37] sm:$0x1] %vm673_vm3, %v2037_v2 }
 0x2f5   : > { %v1943_v3 = vpop.permute.xlu1 %1942 }
 0x2f6   : > { %2869 = vst.msk [vmem:[%s4027_s23 + $0x51] sm:$0x1] %vm673_vm3, %v1943_v3 }
 0x2f7   : > { %v1945_v4 = vpop.permute.xlu0 %1944 }
 0x2f8   : > { %2870 = vst.msk [vmem:[%s4027_s23 + $0x71] sm:$0x1] %vm673_vm3, %v1945_v4 }
 0x2f9   : > { %v1959_v5 = vpop.permute.xlu1 %1958 }
 0x2fa   : > { %2873 = vst.msk [vmem:[%s4027_s23 + $0x52] sm:$0x1] %vm673_vm3, %v1959_v5 }
 0x2fb   : > { %v1961_v7 = vpop.permute.xlu0 %1960 }
 0x2fc   : > { %2874 = vst.msk [vmem:[%s4027_s23 + $0x72] sm:$0x1] %vm673_vm3, %v1961_v7 }
 0x2fd   : > { %v1975_v8 = vpop.permute.xlu1 %1974 }
 0x2fe   : > { %2877 = vst.msk [vmem:[%s4027_s23 + $0x53] sm:$0x1] %vm673_vm3, %v1975_v8 }
 0x2ff   : > { %v1977_v0 = vpop.permute.xlu0 %1976 }
 0x300   : > { %2878 = vst.msk [vmem:[%s4027_s23 + $0x73] sm:$0x1] %vm673_vm3, %v1977_v0 }
 0x301   : > { %v1991_v9 = vpop.permute.xlu1 %1990 }
 0x302   : > { %2881 = vst.msk [vmem:[%s4027_s23 + $0x54] sm:$0x1] %vm673_vm3, %v1991_v9 }
 0x303   : > { %v1993_v10 = vpop.permute.xlu0 %1992 }
 0x304   : > { %2882 = vst.msk [vmem:[%s4027_s23 + $0x74] sm:$0x1] %vm673_vm3, %v1993_v10 }
 0x305   : > { %v2007_v11 = vpop.permute.xlu1 %2006 }
 0x306   : > { %2885 = vst.msk [vmem:[%s4027_s23 + $0x55] sm:$0x1] %vm673_vm3, %v2007_v11 }
 0x307   : > { %v2009_v12 = vpop.permute.xlu0 %2008 }
 0x308   : > { %2886 = vst.msk [vmem:[%s4027_s23 + $0x75] sm:$0x1] %vm673_vm3, %v2009_v12 }
 0x309   : > { %v2023_v13 = vpop.permute.xlu1 %2022 }
 0x30a   : > { %2889 = vst.msk [vmem:[%s4027_s23 + $0x56] sm:$0x1] %vm673_vm3, %v2023_v13 }
 0x30b   : > { %v2025_v14 = vpop.permute.xlu0 %2024 }
 0x30c   : > { %2890 = vst.msk [vmem:[%s4027_s23 + $0x76] sm:$0x1] %vm673_vm3, %v2025_v14 }
 0x30d   : > { %v2039_v15 = vpop.permute.xlu1 %2038 }
 0x30e   : > { %2893 = vst.msk [vmem:[%s4027_s23 + $0x57] sm:$0x1] %vm673_vm3, %v2039_v15 }
 0x30f   : > { %v2041_v16 = vpop.permute.xlu0 %2040 }
 0x310   : > { %2894 = vst.msk [vmem:[%s4027_s23 + $0x77] sm:$0x1] %vm673_vm3, %v2041_v16 }
 0x311   : > { %v2563_v17 = vpop.permute.xlu1 %2562 }
 0x312   : > { %2915 = vst.msk [vmem:[%s4027_s23 + $0x19] sm:$0x1] %vm673_vm3, %v2563_v17 }
 0x313   : > { %v2565_v18 = vpop.permute.xlu0 %2564 }
 0x314   : > { %2916 = vst.msk [vmem:[%s4027_s23 + $0x39] sm:$0x1] %vm673_vm3, %v2565_v18 }
 0x315   : > { %v2579_v20 = vpop.permute.xlu1 %2578 }
 0x316   : > { %2919 = vst.msk [vmem:[%s4027_s23 + $0x1a] sm:$0x1] %vm673_vm3, %v2579_v20 }
 0x317   : > { %v2581_v21 = vpop.permute.xlu0 %2580 }
 0x318   : > { %2920 = vst.msk [vmem:[%s4027_s23 + $0x3a] sm:$0x1] %vm673_vm3, %v2581_v21 }
 0x319   : > { %v2595_v22 = vpop.permute.xlu1 %2594 }
 0x31a   : > { %2923 = vst.msk [vmem:[%s4027_s23 + $0x1b] sm:$0x1] %vm673_vm3, %v2595_v22 }
 0x31b   : > { %v2597_v23 = vpop.permute.xlu0 %2596 }
 0x31c   : > { %2924 = vst.msk [vmem:[%s4027_s23 + $0x3b] sm:$0x1] %vm673_vm3, %v2597_v23 }
 0x31d   : > { %v2611_v19 = vpop.permute.xlu1 %2610 }
 0x31e   : > { %2927 = vst.msk [vmem:[%s4027_s23 + $0x1c] sm:$0x1] %vm673_vm3, %v2611_v19 }
 0x31f   : > { %v2613_v24 = vpop.permute.xlu0 %2612 }
 0x320   : > { %2928 = vst.msk [vmem:[%s4027_s23 + $0x3c] sm:$0x1] %vm673_vm3, %v2613_v24 }
 0x321   : > { %v2627_v25 = vpop.permute.xlu1 %2626 }
 0x322   : > { %2931 = vst.msk [vmem:[%s4027_s23 + $0x1d] sm:$0x1] %vm673_vm3, %v2627_v25 }
 0x323   : > { %v2629_v26 = vpop.permute.xlu0 %2628 }
 0x324   : > { %2932 = vst.msk [vmem:[%s4027_s23 + $0x3d] sm:$0x1] %vm673_vm3, %v2629_v26 }
 0x325   : > { %v2643_v27 = vpop.permute.xlu1 %2642 }
 0x326   : > { %2935 = vst.msk [vmem:[%s4027_s23 + $0x1e] sm:$0x1] %vm673_vm3, %v2643_v27 }
 0x327   : > { %v2645_v28 = vpop.permute.xlu0 %2644 }
 0x328   : > { %2936 = vst.msk [vmem:[%s4027_s23 + $0x3e] sm:$0x1] %vm673_vm3, %v2645_v28 }
 0x329   : > { %v2659_v29 = vpop.permute.xlu1 %2658 }
 0x32a   : > { %2939 = vst.msk [vmem:[%s4027_s23 + $0x1f] sm:$0x1] %vm673_vm3, %v2659_v29 }
 0x32b   : > { %v2661_v30 = vpop.permute.xlu0 %2660 }
 0x32c   : > { %2940 = vst.msk [vmem:[%s4027_s23 + $0x3f] sm:$0x1] %vm673_vm3, %v2661_v30 }
 0x32d   : > { %v2567_v31 = vpop.permute.xlu1 %2566 }
 0x32e   : > { %2917 = vst.msk [vmem:[%s4027_s23 + $0x59] sm:$0x1] %vm673_vm3, %v2567_v31 }
 0x32f   : > { %v2569_v32 = vpop.permute.xlu0 %2568 }
 0x330   : > { %2918 = vst.msk [vmem:[%s4027_s23 + $0x79] sm:$0x1] %vm673_vm3, %v2569_v32 }
 0x331   : > { %v2583_v33 = vpop.permute.xlu1 %2582 }
 0x332   : > { %2921 = vst.msk [vmem:[%s4027_s23 + $0x5a] sm:$0x1] %vm673_vm3, %v2583_v33 }
 0x333   : > { %v2585_v34 = vpop.permute.xlu0 %2584 }
 0x334   : > { %2922 = vst.msk [vmem:[%s4027_s23 + $0x7a] sm:$0x1] %vm673_vm3, %v2585_v34 }
 0x335   : > { %v2599_v35 = vpop.permute.xlu1 %2598 }
 0x336   : > { %2925 = vst.msk [vmem:[%s4027_s23 + $0x5b] sm:$0x1] %vm673_vm3, %v2599_v35 }
 0x337   : > { %v2601_v36 = vpop.permute.xlu0 %2600 }
 0x338   : > { %2926 = vst.msk [vmem:[%s4027_s23 + $0x7b] sm:$0x1] %vm673_vm3, %v2601_v36 }
 0x339   : > { %v2615_v37 = vpop.permute.xlu1 %2614 }
 0x33a   : > { %2929 = vst.msk [vmem:[%s4027_s23 + $0x5c] sm:$0x1] %vm673_vm3, %v2615_v37 }
 0x33b   : > { %v2617_v38 = vpop.permute.xlu0 %2616 }
 0x33c   : > { %2930 = vst.msk [vmem:[%s4027_s23 + $0x7c] sm:$0x1] %vm673_vm3, %v2617_v38 }
 0x33d   : > { %v2631_v39 = vpop.permute.xlu1 %2630 }
 0x33e   : > { %2933 = vst.msk [vmem:[%s4027_s23 + $0x5d] sm:$0x1] %vm673_vm3, %v2631_v39 }
 0x33f   : > { %v2633_v40 = vpop.permute.xlu0 %2632 }
 0x340   : > { %2934 = vst.msk [vmem:[%s4027_s23 + $0x7d] sm:$0x1] %vm673_vm3, %v2633_v40 }
 0x341   : > { %v2647_v41 = vpop.permute.xlu1 %2646 }
 0x342   : > { %2937 = vst.msk [vmem:[%s4027_s23 + $0x5e] sm:$0x1] %vm673_vm3, %v2647_v41 }
 0x343   : > { %v2649_v6 = vpop.permute.xlu0 %2648 }
 0x344   : > { %2938 = vst.msk [vmem:[%s4027_s23 + $0x7e] sm:$0x1] %vm673_vm3, %v2649_v6 }
 0x345   : > { %v2663_v42 = vpop.permute.xlu1 %2662 }
 0x346   : > { %2941 = vst.msk [vmem:[%s4027_s23 + $0x5f] sm:$0x1] %vm673_vm3, %v2663_v42 }
 0x347   : > { %v2665_v43 = vpop.permute.xlu0 %2664 }
 0x348   : > { %2942 = vst.msk [vmem:[%s4027_s23 + $0x7f] sm:$0x1] %vm673_vm3, %v2665_v43 }
 0x349   : > { %3527 = shalt.err (!%p3524_p7)
}
 0x34a   : > { %s3528_s27 = scalar_lea.hbm %s4451_s29, 2048  ;;  %s3532_s28 = scalar_lea.hbm %s4503_s2, 4096 }
 0x34b   : > { %p3529_p9 = scmp.ne.s32.totalorder %s4451_s29, %s3528_s27  ;;  %p3533_p5 = scmp.lt.u32.totalorder %s4451_s29, %s4503_s2 }
 0x34c   : > { %p3534_p1 = scmp.lt.u32.totalorder %s3532_s28, %s3528_s27  ;;  %p3536_p4 = scmp.lt.u32.totalorder %s3528_s27, %s4451_s29 }
 0x34d   : > { %p3530_p2 = pnand %p3529_p9, %p3713_p12 }
 0x34e   : > { %p3535_p11 = por %p3534_p1, %p3533_p5 }
 0x34f   : > { %p3531_p0 = pneg %p3530_p2 }
 0x350   : > { %p3537_p6 = por %p3536_p4, %p3535_p11 }
 0x352   : > { %p3538_p8 = pnand %p3537_p6, %p3531_p0 }
 0x354   : > { %3541 = shalt.err (!%p3538_p8)
}
 0x355   : > { %s3605_s6 = smov 128   ;;  %s3606_s7 = smov 8  }
 0x356   : > { %3372 = dma.vmem_to_hbm [thread:$0]  (%p3713_p12), %s4453_s25, 2048, %s4451_s29, %s2675_s13, %s3605_s6, %s3605_s6, %s3606_s7  }
 0x357 PF: > { %s2703_s18 = sand.u32 1, %s3572_s9   ;;  %p4518_p10 = scmp.ne.s32.totalorder %s4508_s16, 0 }
 0x358   : > { %p4519_p13 = scmp.ge.s32.totalorder %s3584_s12, 2  ;;  %s2704_s24 = scalar_lea.sflag [#allocation4], %s2703_s18 }
 0x35a   : > { %p3383_p3 = pnand %p4519_p13, %p4518_p10 }
 0x35c   : > { %3567 = dma.done.wait (!%p3383_p3), %s2704_s24, 2048  }
 0x35d   : > { %3569 = vsyncadd (!%p3383_p3), %s2704_s24, 4294965248  ;;  %p16_p7 = scmp.ge.s32.totalorder %s3678_s21, 4   ;;  %s4520_s9 = smov %s3576_s10 }
 0x35e   : > { %s4521_s10 = smov %s3580_s11  ;;  %s4522_s11 = smov %s3709_s8 }
 0x35f   : > { %s4523_s12 = smov %s3678_s21  ;;  %18 = sbr.rel (!%p16_p7) target bundleno = 6 (0x6), region = 92 }
 0x366   :  { %2709 = vsyncpa [#allocation3], 1 }
 0x367   :  { %2711 = vsyncpa [#allocation3 + $0x1], 1 }
 0x368   :  { %2712 = vsyncpa [#allocation6], 1 }
 0x369   :  { %2714 = vsyncpa [#allocation6 + $0x1], 1 }
 0x36a   :  { %2715 = vsyncpa [#allocation4], 1 }
 0x36b   :  { %2717 = vsyncpa [#allocation4 + $0x1], 1 }

</bundles_post_ra>
